<compile_context>
chip_gen: v5e
topology: v5e:2x2
jax: 0.10.0
libtpu: 0.0.40
codegen_flags: <defaults>
</compile_context>

<pallas_src>
import functools
import math

import jax
import jax.numpy as jnp
from jax.experimental import pallas as pl
from jax.experimental.pallas import tpu as pltpu

# ----------------------- small synthetic BERT config -----------------------
VOCAB = 128
MAX_POS = 32
TYPE_VOCAB = 2
HIDDEN = 32
N_HEADS = 4
HEAD_DIM = HIDDEN // N_HEADS
INTERMEDIATE = 64
N_LAYERS = 2
LN_EPS = 1e-12

# Lane-padded sizes (last dim 128 -> lane-dense vregs and unmasked stores).
HP = 128   # padded hidden
IP = 128   # padded intermediate


# --------------------------- fused forward kernel ---------------------------
def _bert_fused_kernel(
    emb_ref, mask_ref, wqkvo_ref, wffn_ref, vec_ref, glob_ref,
    score_ref, cls_ref,
    *, batch, seq, n_layers,
):
    f32 = jnp.float32
    bf16 = jnp.bfloat16
    rows = batch * seq
    scale = 1.0 / math.sqrt(HEAD_DIM)
    inv_h = 1.0 / HIDDEN

    # Lane mask selecting the real (unpadded) HIDDEN features.
    lane = jax.lax.broadcasted_iota(jnp.int32, (1, HP), 1)
    lane_mask = (lane < HIDDEN).astype(f32)                   # [1, HP]

    def layer_norm(y, g, b):
        # y is zero in padded lanes; statistics taken over the HIDDEN real lanes only.
        mu = jnp.sum(y, axis=-1, keepdims=True) * inv_h
        c = (y - mu) * lane_mask
        var = jnp.sum(c * c, axis=-1, keepdims=True) * inv_h
        # g, b are zero in padded lanes -> output stays zero in padded lanes.
        return c * jax.lax.rsqrt(var + LN_EPS) * g + b

    def gelu(y):
        # TODO(synk): tanh-approximate GELU instead of exact erf GELU.
        return 0.5 * y * (1.0 + jnp.tanh(0.7978845608028654 * (y + 0.044715 * y * y * y)))

    mask = mask_ref[...]                                      # [R, R] f32 additive mask
    gv = glob_ref[...]                                        # [4, HP] f32
    emb_g, emb_b, dense_w = gv[0:1, :], gv[1:2, :], gv[2:3, :]
    dense_b = gv[3:4, 0:1]                                    # [1, 1]

    # Embedding LayerNorm (input already summed + zero-padded in the wrapper).
    x = layer_norm(emb_ref[...], emb_g, emb_b)                # [R, HP] f32

    for l in range(n_layers):
        vl = vec_ref[l]                                       # [10, HP] f32
        bq, bk, bv, bo = vl[0:1, :], vl[1:2, :], vl[2:3, :], vl[3:4, :]
        ln1g, ln1b = vl[4:5, :], vl[5:6, :]
        b1, b2 = vl[6:7, :], vl[7:8, :]
        ln2g, ln2b = vl[8:9, :], vl[9:10, :]

        x_bf = x.astype(bf16)
        # Full-width projections: one [R, HP] @ [HP, HP] dot each (bf16 MXU, f32 acc).
        q = jnp.dot(x_bf, wqkvo_ref[l, 0], preferred_element_type=f32) + bq
        k = jnp.dot(x_bf, wqkvo_ref[l, 1], preferred_element_type=f32) + bk
        v = jnp.dot(x_bf, wqkvo_ref[l, 2], preferred_element_type=f32) + bv
        wo = wqkvo_ref[l, 3]                                  # [HP, HP] bf16

        # Per-head attention over ALL rows at once (mask handles batch blocks).
        # Per-head context is folded into the matching Wo row-block and
        # accumulated in a traced f32 value (no scratch RMW).
        attn = jnp.zeros((rows, HP), f32)
        for h in range(N_HEADS):
            c0 = h * HEAD_DIM
            qh = q[:, c0:c0 + HEAD_DIM].astype(bf16)          # [R, dh]
            kh = k[:, c0:c0 + HEAD_DIM].astype(bf16)
            vh = v[:, c0:c0 + HEAD_DIM].astype(bf16)
            s = jax.lax.dot_general(qh, kh, (((1,), (1,)), ((), ())),
                                    preferred_element_type=f32) * scale + mask   # [R, R]
            s = s - jnp.max(s, axis=-1, keepdims=True)
            p = jnp.exp(s)
            p = p * pl.reciprocal(jnp.sum(p, axis=-1, keepdims=True), approx=True)
            ctx = jnp.dot(p.astype(bf16), vh, preferred_element_type=f32)        # [R, dh]
            attn = attn + jnp.dot(ctx.astype(bf16), wo[c0:c0 + HEAD_DIM, :],
                                  preferred_element_type=f32)                    # [R, HP]

        x = layer_norm(attn + bo + x, ln1g, ln1b)

        # Feed-forward (bf16 MXU operands, f32 accumulation / activation math).
        h1 = jnp.dot(x.astype(bf16), wffn_ref[l, 0], preferred_element_type=f32) + b1   # [R, IP]
        h1 = gelu(h1)
        h2 = jnp.dot(h1.astype(bf16), wffn_ref[l, 1], preferred_element_type=f32) + b2  # [R, HP]
        x = layer_norm(h2 + x, ln2g, ln2b)

    # Scoring head: gather all CLS rows once, one reduce, one store each.
    cls_rows = jnp.concatenate(
        [x[b * seq:b * seq + 1, :] for b in range(batch)], axis=0)               # [B, HP]
    cls_ref[...] = cls_rows
    score_ref[...] = jnp.sum(cls_rows * dense_w, axis=-1, keepdims=True) + dense_b


# ------------------------------ parameter init ------------------------------
def init_params(key):
    def w(k, shape):
        return jax.random.normal(k, shape, jnp.float32) * 0.02

    keys = iter(jax.random.split(key, 64))
    params = {
        "word_emb": w(next(keys), (VOCAB, HIDDEN)),
        "pos_emb": w(next(keys), (MAX_POS, HIDDEN)),
        "tok_emb": w(next(keys), (TYPE_VOCAB, HIDDEN)),
        "emb_ln_g": jnp.ones((HIDDEN,), jnp.float32),
        "emb_ln_b": jnp.zeros((HIDDEN,), jnp.float32),
        "layers": [],
        # task == 'ranking' -> nn.Linear(hidden_size, 1)
        "dense_w": w(next(keys), (HIDDEN, 1)),
        "dense_b": jnp.zeros((1,), jnp.float32),
    }
    for _ in range(N_LAYERS):
        layer = {
            "wq": w(next(keys), (HIDDEN, HIDDEN)), "bq": jnp.zeros((HIDDEN,), jnp.float32),
            "wk": w(next(keys), (HIDDEN, HIDDEN)), "bk": jnp.zeros((HIDDEN,), jnp.float32),
            "wv": w(next(keys), (HIDDEN, HIDDEN)), "bv": jnp.zeros((HIDDEN,), jnp.float32),
            "wo": w(next(keys), (HIDDEN, HIDDEN)), "bo": jnp.zeros((HIDDEN,), jnp.float32),
            "ln1_g": jnp.ones((HIDDEN,), jnp.float32), "ln1_b": jnp.zeros((HIDDEN,), jnp.float32),
            "w1": w(next(keys), (HIDDEN, INTERMEDIATE)), "b1": jnp.zeros((INTERMEDIATE,), jnp.float32),
            "w2": w(next(keys), (INTERMEDIATE, HIDDEN)), "b2": jnp.zeros((HIDDEN,), jnp.float32),
            "ln2_g": jnp.ones((HIDDEN,), jnp.float32), "ln2_b": jnp.zeros((HIDDEN,), jnp.float32),
        }
        params["layers"].append(layer)
    return params


# --------------------------- wrapper-side packing ----------------------------
def _pad2(w, r, c):
    return jnp.pad(w, ((0, r - w.shape[0]), (0, c - w.shape[1])))


def _pad1(v, n):
    return jnp.pad(v, (0, n - v.shape[0]))


def _pack_params(params):
    """Zero-pad everything to 128 lanes and pack into 4 stacked arrays so the
    kernel does only leading-axis ref indexing and all vregs/stores are lane-dense."""
    bf16, f32 = jnp.bfloat16, jnp.float32
    layers = params["layers"]
    wqkvo = jnp.stack([
        jnp.stack([_pad2(l["wq"], HP, HP), _pad2(l["wk"], HP, HP),
                   _pad2(l["wv"], HP, HP), _pad2(l["wo"], HP, HP)], axis=0)
        for l in layers], axis=0).astype(bf16)                     # [L, 4, HP, HP]
    wffn = jnp.stack([
        jnp.stack([_pad2(l["w1"], HP, IP), _pad2(l["w2"], IP, HP)], axis=0)
        for l in layers], axis=0).astype(bf16)                     # [L, 2, 128, 128]
    vecs = jnp.stack([
        jnp.stack([_pad1(l["bq"], HP), _pad1(l["bk"], HP), _pad1(l["bv"], HP),
                   _pad1(l["bo"], HP), _pad1(l["ln1_g"], HP), _pad1(l["ln1_b"], HP),
                   _pad1(l["b1"], HP), _pad1(l["b2"], HP),
                   _pad1(l["ln2_g"], HP), _pad1(l["ln2_b"], HP)], axis=0)
        for l in layers], axis=0).astype(f32)                      # [L, 10, HP]
    glob = jnp.stack([
        _pad1(params["emb_ln_g"], HP), _pad1(params["emb_ln_b"], HP),
        _pad1(params["dense_w"][:, 0], HP), _pad1(params["dense_b"], HP)],
        axis=0).astype(f32)                                        # [4, HP]
    return wqkvo, wffn, vecs, glob


# ------------------------------ model forward -------------------------------
def bert_forward(params, input_ids, input_mask, segment_ids):
    """Returns (score, cls_hidden) mirroring Bert.forward with mode='cls', task='ranking'."""
    B, S = input_ids.shape
    R = B * S

    # Embedding gathers are glue (XLA); everything downstream is one fused kernel.
    word = jnp.take(params["word_emb"], input_ids, axis=0)         # [B,S,H]
    pos = params["pos_emb"][:S][None, :, :]                        # [1,S,H]
    tok = jnp.take(params["tok_emb"], segment_ids, axis=0)         # [B,S,H]
    emb = (word + pos + tok).reshape(R, HIDDEN).astype(jnp.float32)
    emb_p = jnp.pad(emb, ((0, 0), (0, HP - HIDDEN)))               # [R, HP]

    # Additive attention mask over keys, block-diagonal across batches:
    #   within batch : (1 - mask) * -10000  (matches BERT semantics)
    #   cross batch  : -1e9                 (no cross-batch attention)
    key_add = ((1.0 - input_mask.astype(jnp.float32)) * -10000.0).reshape(R)
    batch_ids = jnp.repeat(jnp.arange(B), S)
    same = batch_ids[:, None] == batch_ids[None, :]
    mask_full = jnp.where(same, key_add[None, :], jnp.float32(-1e9))   # [R, R]

    wqkvo, wffn, vecs, glob = _pack_params(params)

    kern = functools.partial(_bert_fused_kernel, batch=B, seq=S, n_layers=N_LAYERS)
    vmem = pl.BlockSpec(memory_space=pltpu.MemorySpace.VMEM)

    score2d, cls_p = pl.pallas_call(
        kern,
        out_shape=(jax.ShapeDtypeStruct((B, 1), jnp.float32),
                   jax.ShapeDtypeStruct((B, HP), jnp.float32)),
        in_specs=[vmem] * 6,
        out_specs=(vmem, vmem),
    )(emb_p, mask_full, wqkvo, wffn, vecs, glob)

    return score2d[:, 0], cls_p[:, :HIDDEN]


# ---------------------------------- main -------------------------------------
if __name__ == "__main__":
    key = jax.random.PRNGKey(0)
    k_params, k_ids, k_seg = jax.random.split(key, 3)

    params = init_params(k_params)

    B, S = 2, 8
    input_ids = jax.random.randint(k_ids, (B, S), 0, VOCAB, dtype=jnp.int32)
    input_mask = jnp.array([[1, 1, 1, 1, 1, 1, 1, 1],
                            [1, 1, 1, 1, 1, 1, 0, 0]], dtype=jnp.int32)
    segment_ids = jax.random.randint(k_seg, (B, S), 0, TYPE_VOCAB, dtype=jnp.int32)

    fwd = jax.jit(bert_forward)
    score, cls_hidden = fwd(params, input_ids, input_mask, segment_ids)
    jax.block_until_ready((score, cls_hidden))

    assert score.shape == (B,), score.shape
    assert cls_hidden.shape == (B, HIDDEN), cls_hidden.shape
    assert bool(jnp.all(jnp.isfinite(score))) and bool(jnp.all(jnp.isfinite(cls_hidden)))
    print("KERNEL_OK")
</pallas_src>

<mosaic_0001>
module attributes {stable_mosaic.version = 11 : i64} {
  func.func @_bert_fused_kernel(%arg0: memref<16x128xf32, #tpu.memory_space<vmem>>, %arg1: memref<16x16xf32, #tpu.memory_space<vmem>>, %arg2: memref<2x4x128x128xbf16, #tpu.memory_space<vmem>>, %arg3: memref<2x2x128x128xbf16, #tpu.memory_space<vmem>>, %arg4: memref<2x10x128xf32, #tpu.memory_space<vmem>>, %arg5: memref<4x128xf32, #tpu.memory_space<vmem>>, %arg6: memref<2x1xf32, #tpu.memory_space<vmem>>, %arg7: memref<2x128xf32, #tpu.memory_space<vmem>>) attributes {dimension_semantics = [], scalar_prefetch = 0 : i64, scratch_operands = 0 : i64, tpu.core_type = #tpu.core_type<tc>} {
    %0 = tpu.iota {dimensions = array<i32: 1>} : vector<1x128xi32>
    %c32_i32 = arith.constant 32 : i32
    %1 = vector.broadcast %c32_i32 : i32 to vector<1x128xi32>
    %2 = arith.cmpi slt, %0, %1 : vector<1x128xi32>
    %3 = arith.extui %2 : vector<1x128xi1> to vector<1x128xi32>
    %4 = arith.sitofp %3 : vector<1x128xi32> to vector<1x128xf32>
    %c0 = arith.constant 0 : index
    %c0_0 = arith.constant 0 : index
    %5 = vector.load %arg1[%c0, %c0_0] : memref<16x16xf32, #tpu.memory_space<vmem>>, vector<16x16xf32>
    %c0_1 = arith.constant 0 : index
    %c0_2 = arith.constant 0 : index
    %6 = vector.load %arg5[%c0_1, %c0_2] : memref<4x128xf32, #tpu.memory_space<vmem>>, vector<4x128xf32>
    %7 = vector.extract_strided_slice %6 {offsets = [0, 0], sizes = [1, 128], strides = [1, 1]} : vector<4x128xf32> to vector<1x128xf32>
    %8 = vector.extract_strided_slice %6 {offsets = [1, 0], sizes = [1, 128], strides = [1, 1]} : vector<4x128xf32> to vector<1x128xf32>
    %9 = vector.extract_strided_slice %6 {offsets = [2, 0], sizes = [1, 128], strides = [1, 1]} : vector<4x128xf32> to vector<1x128xf32>
    %10 = vector.extract_strided_slice %6 {offsets = [3, 0], sizes = [1, 1], strides = [1, 1]} : vector<4x128xf32> to vector<1x1xf32>
    %c0_3 = arith.constant 0 : index
    %c0_4 = arith.constant 0 : index
    %11 = vector.load %arg0[%c0_3, %c0_4] : memref<16x128xf32, #tpu.memory_space<vmem>>, vector<16x128xf32>
    %cst = arith.constant dense<0.000000e+00> : vector<16xf32>
    %12 = vector.multi_reduction <add>, %11, %cst [1] : vector<16x128xf32> to vector<16xf32>
    %13 = vector.shape_cast %12 : vector<16xf32> to vector<16x1xf32>
    %cst_5 = arith.constant 3.125000e-02 : f32
    %14 = vector.broadcast %cst_5 : f32 to vector<16x1xf32>
    %15 = arith.mulf %13, %14 : vector<16x1xf32>
    %16 = vector.broadcast %15 : vector<16x1xf32> to vector<16x128xf32>
    %17 = arith.subf %11, %16 : vector<16x128xf32>
    %18 = vector.broadcast %4 : vector<1x128xf32> to vector<16x128xf32>
    %19 = arith.mulf %17, %18 : vector<16x128xf32>
    %20 = arith.mulf %19, %19 : vector<16x128xf32>
    %cst_6 = arith.constant dense<0.000000e+00> : vector<16xf32>
    %21 = vector.multi_reduction <add>, %20, %cst_6 [1] : vector<16x128xf32> to vector<16xf32>
    %22 = vector.shape_cast %21 : vector<16xf32> to vector<16x1xf32>
    %cst_7 = arith.constant 3.125000e-02 : f32
    %23 = vector.broadcast %cst_7 : f32 to vector<16x1xf32>
    %24 = arith.mulf %22, %23 : vector<16x1xf32>
    %cst_8 = arith.constant 9.99999996E-13 : f32
    %25 = vector.broadcast %cst_8 : f32 to vector<16x1xf32>
    %26 = arith.addf %24, %25 : vector<16x1xf32>
    %27 = math.rsqrt %26 : vector<16x1xf32>
    %28 = vector.broadcast %27 : vector<16x1xf32> to vector<16x128xf32>
    %29 = arith.mulf %19, %28 : vector<16x128xf32>
    %30 = vector.broadcast %7 : vector<1x128xf32> to vector<16x128xf32>
    %31 = arith.mulf %29, %30 : vector<16x128xf32>
    %32 = vector.broadcast %8 : vector<1x128xf32> to vector<16x128xf32>
    %33 = arith.addf %31, %32 : vector<16x128xf32>
    %c0_9 = arith.constant 0 : index
    %c0_10 = arith.constant 0 : index
    %c0_11 = arith.constant 0 : index
    %34 = vector.load %arg4[%c0_9, %c0_10, %c0_11] : memref<2x10x128xf32, #tpu.memory_space<vmem>>, vector<1x10x128xf32>
    %35 = vector.shape_cast %34 : vector<1x10x128xf32> to vector<10x128xf32>
    %36 = vector.extract_strided_slice %35 {offsets = [0, 0], sizes = [1, 128], strides = [1, 1]} : vector<10x128xf32> to vector<1x128xf32>
    %37 = vector.extract_strided_slice %35 {offsets = [1, 0], sizes = [1, 128], strides = [1, 1]} : vector<10x128xf32> to vector<1x128xf32>
    %38 = vector.extract_strided_slice %35 {offsets = [2, 0], sizes = [1, 128], strides = [1, 1]} : vector<10x128xf32> to vector<1x128xf32>
    %39 = vector.extract_strided_slice %35 {offsets = [3, 0], sizes = [1, 128], strides = [1, 1]} : vector<10x128xf32> to vector<1x128xf32>
    %40 = vector.extract_strided_slice %35 {offsets = [4, 0], sizes = [1, 128], strides = [1, 1]} : vector<10x128xf32> to vector<1x128xf32>
    %41 = vector.extract_strided_slice %35 {offsets = [5, 0], sizes = [1, 128], strides = [1, 1]} : vector<10x128xf32> to vector<1x128xf32>
    %42 = vector.extract_strided_slice %35 {offsets = [6, 0], sizes = [1, 128], strides = [1, 1]} : vector<10x128xf32> to vector<1x128xf32>
    %43 = vector.extract_strided_slice %35 {offsets = [7, 0], sizes = [1, 128], strides = [1, 1]} : vector<10x128xf32> to vector<1x128xf32>
    %44 = vector.extract_strided_slice %35 {offsets = [8, 0], sizes = [1, 128], strides = [1, 1]} : vector<10x128xf32> to vector<1x128xf32>
    %45 = vector.extract_strided_slice %35 {offsets = [9, 0], sizes = [1, 128], strides = [1, 1]} : vector<10x128xf32> to vector<1x128xf32>
    %46 = arith.truncf %33 : vector<16x128xf32> to vector<16x128xbf16>
    %c0_12 = arith.constant 0 : index
    %c0_13 = arith.constant 0 : index
    %c0_14 = arith.constant 0 : index
    %c0_15 = arith.constant 0 : index
    %47 = vector.load %arg2[%c0_12, %c0_13, %c0_14, %c0_15] : memref<2x4x128x128xbf16, #tpu.memory_space<vmem>>, vector<1x1x128x128xbf16>
    %48 = vector.shape_cast %47 : vector<1x1x128x128xbf16> to vector<128x128xbf16>
    %cst_16 = arith.constant dense<0.000000e+00> : vector<16x128xf32>
    %49 = tpu.matmul %46, %48, %cst_16 {dimension_numbers = #tpu.dot_dimension_numbers<[1], [0], [0], [1], [0, 0, 1, 1], [], []>} : vector<16x128xbf16>, vector<128x128xbf16>, vector<16x128xf32> -> vector<16x128xf32>
    %50 = vector.broadcast %36 : vector<1x128xf32> to vector<16x128xf32>
    %51 = arith.addf %49, %50 : vector<16x128xf32>
    %c0_17 = arith.constant 0 : index
    %c1 = arith.constant 1 : index
    %c0_18 = arith.constant 0 : index
    %c0_19 = arith.constant 0 : index
    %52 = vector.load %arg2[%c0_17, %c1, %c0_18, %c0_19] : memref<2x4x128x128xbf16, #tpu.memory_space<vmem>>, vector<1x1x128x128xbf16>
    %53 = vector.shape_cast %52 : vector<1x1x128x128xbf16> to vector<128x128xbf16>
    %cst_20 = arith.constant dense<0.000000e+00> : vector<16x128xf32>
    %54 = tpu.matmul %46, %53, %cst_20 {dimension_numbers = #tpu.dot_dimension_numbers<[1], [0], [0], [1], [0, 0, 1, 1], [], []>} : vector<16x128xbf16>, vector<128x128xbf16>, vector<16x128xf32> -> vector<16x128xf32>
    %55 = vector.broadcast %37 : vector<1x128xf32> to vector<16x128xf32>
    %56 = arith.addf %54, %55 : vector<16x128xf32>
    %c0_21 = arith.constant 0 : index
    %c2 = arith.constant 2 : index
    %c0_22 = arith.constant 0 : index
    %c0_23 = arith.constant 0 : index
    %57 = vector.load %arg2[%c0_21, %c2, %c0_22, %c0_23] : memref<2x4x128x128xbf16, #tpu.memory_space<vmem>>, vector<1x1x128x128xbf16>
    %58 = vector.shape_cast %57 : vector<1x1x128x128xbf16> to vector<128x128xbf16>
    %cst_24 = arith.constant dense<0.000000e+00> : vector<16x128xf32>
    %59 = tpu.matmul %46, %58, %cst_24 {dimension_numbers = #tpu.dot_dimension_numbers<[1], [0], [0], [1], [0, 0, 1, 1], [], []>} : vector<16x128xbf16>, vector<128x128xbf16>, vector<16x128xf32> -> vector<16x128xf32>
    %60 = vector.broadcast %38 : vector<1x128xf32> to vector<16x128xf32>
    %61 = arith.addf %59, %60 : vector<16x128xf32>
    %c0_25 = arith.constant 0 : index
    %c3 = arith.constant 3 : index
    %c0_26 = arith.constant 0 : index
    %c0_27 = arith.constant 0 : index
    %62 = vector.load %arg2[%c0_25, %c3, %c0_26, %c0_27] : memref<2x4x128x128xbf16, #tpu.memory_space<vmem>>, vector<1x1x128x128xbf16>
    %63 = vector.shape_cast %62 : vector<1x1x128x128xbf16> to vector<128x128xbf16>
    %cst_28 = arith.constant 0.000000e+00 : f32
    %64 = vector.broadcast %cst_28 : f32 to vector<16x128xf32>
    %65 = vector.extract_strided_slice %51 {offsets = [0, 0], sizes = [16, 8], strides = [1, 1]} : vector<16x128xf32> to vector<16x8xf32>
    %66 = arith.truncf %65 : vector<16x8xf32> to vector<16x8xbf16>
    %67 = vector.extract_strided_slice %56 {offsets = [0, 0], sizes = [16, 8], strides = [1, 1]} : vector<16x128xf32> to vector<16x8xf32>
    %68 = arith.truncf %67 : vector<16x8xf32> to vector<16x8xbf16>
    %69 = vector.extract_strided_slice %61 {offsets = [0, 0], sizes = [16, 8], strides = [1, 1]} : vector<16x128xf32> to vector<16x8xf32>
    %70 = arith.truncf %69 : vector<16x8xf32> to vector<16x8xbf16>
    %cst_29 = arith.constant dense<0.000000e+00> : vector<16x16xf32>
    %71 = tpu.matmul %66, %68, %cst_29 {dimension_numbers = #tpu.dot_dimension_numbers<[1], [1], [0], [0], [0, 0, 1, 0], [], []>} : vector<16x8xbf16>, vector<16x8xbf16>, vector<16x16xf32> -> vector<16x16xf32>
    %cst_30 = arith.constant 0.353553385 : f32
    %72 = vector.broadcast %cst_30 : f32 to vector<16x16xf32>
    %73 = arith.mulf %71, %72 : vector<16x16xf32>
    %74 = arith.addf %73, %5 : vector<16x16xf32>
    %cst_31 = arith.constant dense<0xFF800000> : vector<16xf32>
    %75 = vector.multi_reduction <maximumf>, %74, %cst_31 [1] : vector<16x16xf32> to vector<16xf32>
    %76 = vector.shape_cast %75 : vector<16xf32> to vector<16x1xf32>
    %77 = vector.broadcast %76 : vector<16x1xf32> to vector<16x16xf32>
    %78 = arith.subf %74, %77 : vector<16x16xf32>
    %79 = math.exp %78 : vector<16x16xf32>
    %cst_32 = arith.constant dense<0.000000e+00> : vector<16xf32>
    %80 = vector.multi_reduction <add>, %79, %cst_32 [1] : vector<16x16xf32> to vector<16xf32>
    %81 = vector.shape_cast %80 : vector<16xf32> to vector<16x1xf32>
    %82 = tpu.reciprocal %81 {approx = true} : vector<16x1xf32> -> vector<16x1xf32>
    %83 = vector.broadcast %82 : vector<16x1xf32> to vector<16x16xf32>
    %84 = arith.mulf %79, %83 : vector<16x16xf32>
    %85 = arith.truncf %84 : vector<16x16xf32> to vector<16x16xbf16>
    %cst_33 = arith.constant dense<0.000000e+00> : vector<16x8xf32>
    %86 = tpu.matmul %85, %70, %cst_33 {dimension_numbers = #tpu.dot_dimension_numbers<[1], [0], [0], [1], [0, 0, 1, 1], [], []>} : vector<16x16xbf16>, vector<16x8xbf16>, vector<16x8xf32> -> vector<16x8xf32>
    %87 = arith.truncf %86 : vector<16x8xf32> to vector<16x8xbf16>
    %88 = vector.extract_strided_slice %63 {offsets = [0, 0], sizes = [8, 128], strides = [1, 1]} : vector<128x128xbf16> to vector<8x128xbf16>
    %cst_34 = arith.constant dense<0.000000e+00> : vector<16x128xf32>
    %89 = tpu.matmul %87, %88, %cst_34 {dimension_numbers = #tpu.dot_dimension_numbers<[1], [0], [0], [1], [0, 0, 1, 1], [], []>} : vector<16x8xbf16>, vector<8x128xbf16>, vector<16x128xf32> -> vector<16x128xf32>
    %90 = arith.addf %64, %89 : vector<16x128xf32>
    %91 = vector.extract_strided_slice %51 {offsets = [0, 8], sizes = [16, 8], strides = [1, 1]} : vector<16x128xf32> to vector<16x8xf32>
    %92 = arith.truncf %91 : vector<16x8xf32> to vector<16x8xbf16>
    %93 = vector.extract_strided_slice %56 {offsets = [0, 8], sizes = [16, 8], strides = [1, 1]} : vector<16x128xf32> to vector<16x8xf32>
    %94 = arith.truncf %93 : vector<16x8xf32> to vector<16x8xbf16>
    %95 = vector.extract_strided_slice %61 {offsets = [0, 8], sizes = [16, 8], strides = [1, 1]} : vector<16x128xf32> to vector<16x8xf32>
    %96 = arith.truncf %95 : vector<16x8xf32> to vector<16x8xbf16>
    %cst_35 = arith.constant dense<0.000000e+00> : vector<16x16xf32>
    %97 = tpu.matmul %92, %94, %cst_35 {dimension_numbers = #tpu.dot_dimension_numbers<[1], [1], [0], [0], [0, 0, 1, 0], [], []>} : vector<16x8xbf16>, vector<16x8xbf16>, vector<16x16xf32> -> vector<16x16xf32>
    %cst_36 = arith.constant 0.353553385 : f32
    %98 = vector.broadcast %cst_36 : f32 to vector<16x16xf32>
    %99 = arith.mulf %97, %98 : vector<16x16xf32>
    %100 = arith.addf %99, %5 : vector<16x16xf32>
    %cst_37 = arith.constant dense<0xFF800000> : vector<16xf32>
    %101 = vector.multi_reduction <maximumf>, %100, %cst_37 [1] : vector<16x16xf32> to vector<16xf32>
    %102 = vector.shape_cast %101 : vector<16xf32> to vector<16x1xf32>
    %103 = vector.broadcast %102 : vector<16x1xf32> to vector<16x16xf32>
    %104 = arith.subf %100, %103 : vector<16x16xf32>
    %105 = math.exp %104 : vector<16x16xf32>
    %cst_38 = arith.constant dense<0.000000e+00> : vector<16xf32>
    %106 = vector.multi_reduction <add>, %105, %cst_38 [1] : vector<16x16xf32> to vector<16xf32>
    %107 = vector.shape_cast %106 : vector<16xf32> to vector<16x1xf32>
    %108 = tpu.reciprocal %107 {approx = true} : vector<16x1xf32> -> vector<16x1xf32>
    %109 = vector.broadcast %108 : vector<16x1xf32> to vector<16x16xf32>
    %110 = arith.mulf %105, %109 : vector<16x16xf32>
    %111 = arith.truncf %110 : vector<16x16xf32> to vector<16x16xbf16>
    %cst_39 = arith.constant dense<0.000000e+00> : vector<16x8xf32>
    %112 = tpu.matmul %111, %96, %cst_39 {dimension_numbers = #tpu.dot_dimension_numbers<[1], [0], [0], [1], [0, 0, 1, 1], [], []>} : vector<16x16xbf16>, vector<16x8xbf16>, vector<16x8xf32> -> vector<16x8xf32>
    %113 = arith.truncf %112 : vector<16x8xf32> to vector<16x8xbf16>
    %114 = vector.extract_strided_slice %63 {offsets = [8, 0], sizes = [8, 128], strides = [1, 1]} : vector<128x128xbf16> to vector<8x128xbf16>
    %cst_40 = arith.constant dense<0.000000e+00> : vector<16x128xf32>
    %115 = tpu.matmul %113, %114, %cst_40 {dimension_numbers = #tpu.dot_dimension_numbers<[1], [0], [0], [1], [0, 0, 1, 1], [], []>} : vector<16x8xbf16>, vector<8x128xbf16>, vector<16x128xf32> -> vector<16x128xf32>
    %116 = arith.addf %90, %115 : vector<16x128xf32>
    %117 = vector.extract_strided_slice %51 {offsets = [0, 16], sizes = [16, 8], strides = [1, 1]} : vector<16x128xf32> to vector<16x8xf32>
    %118 = arith.truncf %117 : vector<16x8xf32> to vector<16x8xbf16>
    %119 = vector.extract_strided_slice %56 {offsets = [0, 16], sizes = [16, 8], strides = [1, 1]} : vector<16x128xf32> to vector<16x8xf32>
    %120 = arith.truncf %119 : vector<16x8xf32> to vector<16x8xbf16>
    %121 = vector.extract_strided_slice %61 {offsets = [0, 16], sizes = [16, 8], strides = [1, 1]} : vector<16x128xf32> to vector<16x8xf32>
    %122 = arith.truncf %121 : vector<16x8xf32> to vector<16x8xbf16>
    %cst_41 = arith.constant dense<0.000000e+00> : vector<16x16xf32>
    %123 = tpu.matmul %118, %120, %cst_41 {dimension_numbers = #tpu.dot_dimension_numbers<[1], [1], [0], [0], [0, 0, 1, 0], [], []>} : vector<16x8xbf16>, vector<16x8xbf16>, vector<16x16xf32> -> vector<16x16xf32>
    %cst_42 = arith.constant 0.353553385 : f32
    %124 = vector.broadcast %cst_42 : f32 to vector<16x16xf32>
    %125 = arith.mulf %123, %124 : vector<16x16xf32>
    %126 = arith.addf %125, %5 : vector<16x16xf32>
    %cst_43 = arith.constant dense<0xFF800000> : vector<16xf32>
    %127 = vector.multi_reduction <maximumf>, %126, %cst_43 [1] : vector<16x16xf32> to vector<16xf32>
    %128 = vector.shape_cast %127 : vector<16xf32> to vector<16x1xf32>
    %129 = vector.broadcast %128 : vector<16x1xf32> to vector<16x16xf32>
    %130 = arith.subf %126, %129 : vector<16x16xf32>
    %131 = math.exp %130 : vector<16x16xf32>
    %cst_44 = arith.constant dense<0.000000e+00> : vector<16xf32>
    %132 = vector.multi_reduction <add>, %131, %cst_44 [1] : vector<16x16xf32> to vector<16xf32>
    %133 = vector.shape_cast %132 : vector<16xf32> to vector<16x1xf32>
    %134 = tpu.reciprocal %133 {approx = true} : vector<16x1xf32> -> vector<16x1xf32>
    %135 = vector.broadcast %134 : vector<16x1xf32> to vector<16x16xf32>
    %136 = arith.mulf %131, %135 : vector<16x16xf32>
    %137 = arith.truncf %136 : vector<16x16xf32> to vector<16x16xbf16>
    %cst_45 = arith.constant dense<0.000000e+00> : vector<16x8xf32>
    %138 = tpu.matmul %137, %122, %cst_45 {dimension_numbers = #tpu.dot_dimension_numbers<[1], [0], [0], [1], [0, 0, 1, 1], [], []>} : vector<16x16xbf16>, vector<16x8xbf16>, vector<16x8xf32> -> vector<16x8xf32>
    %139 = arith.truncf %138 : vector<16x8xf32> to vector<16x8xbf16>
    %140 = vector.extract_strided_slice %63 {offsets = [16, 0], sizes = [8, 128], strides = [1, 1]} : vector<128x128xbf16> to vector<8x128xbf16>
    %cst_46 = arith.constant dense<0.000000e+00> : vector<16x128xf32>
    %141 = tpu.matmul %139, %140, %cst_46 {dimension_numbers = #tpu.dot_dimension_numbers<[1], [0], [0], [1], [0, 0, 1, 1], [], []>} : vector<16x8xbf16>, vector<8x128xbf16>, vector<16x128xf32> -> vector<16x128xf32>
    %142 = arith.addf %116, %141 : vector<16x128xf32>
    %143 = vector.extract_strided_slice %51 {offsets = [0, 24], sizes = [16, 8], strides = [1, 1]} : vector<16x128xf32> to vector<16x8xf32>
    %144 = arith.truncf %143 : vector<16x8xf32> to vector<16x8xbf16>
    %145 = vector.extract_strided_slice %56 {offsets = [0, 24], sizes = [16, 8], strides = [1, 1]} : vector<16x128xf32> to vector<16x8xf32>
    %146 = arith.truncf %145 : vector<16x8xf32> to vector<16x8xbf16>
    %147 = vector.extract_strided_slice %61 {offsets = [0, 24], sizes = [16, 8], strides = [1, 1]} : vector<16x128xf32> to vector<16x8xf32>
    %148 = arith.truncf %147 : vector<16x8xf32> to vector<16x8xbf16>
    %cst_47 = arith.constant dense<0.000000e+00> : vector<16x16xf32>
    %149 = tpu.matmul %144, %146, %cst_47 {dimension_numbers = #tpu.dot_dimension_numbers<[1], [1], [0], [0], [0, 0, 1, 0], [], []>} : vector<16x8xbf16>, vector<16x8xbf16>, vector<16x16xf32> -> vector<16x16xf32>
    %cst_48 = arith.constant 0.353553385 : f32
    %150 = vector.broadcast %cst_48 : f32 to vector<16x16xf32>
    %151 = arith.mulf %149, %150 : vector<16x16xf32>
    %152 = arith.addf %151, %5 : vector<16x16xf32>
    %cst_49 = arith.constant dense<0xFF800000> : vector<16xf32>
    %153 = vector.multi_reduction <maximumf>, %152, %cst_49 [1] : vector<16x16xf32> to vector<16xf32>
    %154 = vector.shape_cast %153 : vector<16xf32> to vector<16x1xf32>
    %155 = vector.broadcast %154 : vector<16x1xf32> to vector<16x16xf32>
    %156 = arith.subf %152, %155 : vector<16x16xf32>
    %157 = math.exp %156 : vector<16x16xf32>
    %cst_50 = arith.constant dense<0.000000e+00> : vector<16xf32>
    %158 = vector.multi_reduction <add>, %157, %cst_50 [1] : vector<16x16xf32> to vector<16xf32>
    %159 = vector.shape_cast %158 : vector<16xf32> to vector<16x1xf32>
    %160 = tpu.reciprocal %159 {approx = true} : vector<16x1xf32> -> vector<16x1xf32>
    %161 = vector.broadcast %160 : vector<16x1xf32> to vector<16x16xf32>
    %162 = arith.mulf %157, %161 : vector<16x16xf32>
    %163 = arith.truncf %162 : vector<16x16xf32> to vector<16x16xbf16>
    %cst_51 = arith.constant dense<0.000000e+00> : vector<16x8xf32>
    %164 = tpu.matmul %163, %148, %cst_51 {dimension_numbers = #tpu.dot_dimension_numbers<[1], [0], [0], [1], [0, 0, 1, 1], [], []>} : vector<16x16xbf16>, vector<16x8xbf16>, vector<16x8xf32> -> vector<16x8xf32>
    %165 = arith.truncf %164 : vector<16x8xf32> to vector<16x8xbf16>
    %166 = vector.extract_strided_slice %63 {offsets = [24, 0], sizes = [8, 128], strides = [1, 1]} : vector<128x128xbf16> to vector<8x128xbf16>
    %cst_52 = arith.constant dense<0.000000e+00> : vector<16x128xf32>
    %167 = tpu.matmul %165, %166, %cst_52 {dimension_numbers = #tpu.dot_dimension_numbers<[1], [0], [0], [1], [0, 0, 1, 1], [], []>} : vector<16x8xbf16>, vector<8x128xbf16>, vector<16x128xf32> -> vector<16x128xf32>
    %168 = arith.addf %142, %167 : vector<16x128xf32>
    %169 = vector.broadcast %39 : vector<1x128xf32> to vector<16x128xf32>
    %170 = arith.addf %168, %169 : vector<16x128xf32>
    %171 = arith.addf %170, %33 : vector<16x128xf32>
    %cst_53 = arith.constant dense<0.000000e+00> : vector<16xf32>
    %172 = vector.multi_reduction <add>, %171, %cst_53 [1] : vector<16x128xf32> to vector<16xf32>
    %173 = vector.shape_cast %172 : vector<16xf32> to vector<16x1xf32>
    %cst_54 = arith.constant 3.125000e-02 : f32
    %174 = vector.broadcast %cst_54 : f32 to vector<16x1xf32>
    %175 = arith.mulf %173, %174 : vector<16x1xf32>
    %176 = vector.broadcast %175 : vector<16x1xf32> to vector<16x128xf32>
    %177 = arith.subf %171, %176 : vector<16x128xf32>
    %178 = vector.broadcast %4 : vector<1x128xf32> to vector<16x128xf32>
    %179 = arith.mulf %177, %178 : vector<16x128xf32>
    %180 = arith.mulf %179, %179 : vector<16x128xf32>
    %cst_55 = arith.constant dense<0.000000e+00> : vector<16xf32>
    %181 = vector.multi_reduction <add>, %180, %cst_55 [1] : vector<16x128xf32> to vector<16xf32>
    %182 = vector.shape_cast %181 : vector<16xf32> to vector<16x1xf32>
    %cst_56 = arith.constant 3.125000e-02 : f32
    %183 = vector.broadcast %cst_56 : f32 to vector<16x1xf32>
    %184 = arith.mulf %182, %183 : vector<16x1xf32>
    %cst_57 = arith.constant 9.99999996E-13 : f32
    %185 = vector.broadcast %cst_57 : f32 to vector<16x1xf32>
    %186 = arith.addf %184, %185 : vector<16x1xf32>
    %187 = math.rsqrt %186 : vector<16x1xf32>
    %188 = vector.broadcast %187 : vector<16x1xf32> to vector<16x128xf32>
    %189 = arith.mulf %179, %188 : vector<16x128xf32>
    %190 = vector.broadcast %40 : vector<1x128xf32> to vector<16x128xf32>
    %191 = arith.mulf %189, %190 : vector<16x128xf32>
    %192 = vector.broadcast %41 : vector<1x128xf32> to vector<16x128xf32>
    %193 = arith.addf %191, %192 : vector<16x128xf32>
    %194 = arith.truncf %193 : vector<16x128xf32> to vector<16x128xbf16>
    %c0_58 = arith.constant 0 : index
    %c0_59 = arith.constant 0 : index
    %c0_60 = arith.constant 0 : index
    %c0_61 = arith.constant 0 : index
    %195 = vector.load %arg3[%c0_58, %c0_59, %c0_60, %c0_61] : memref<2x2x128x128xbf16, #tpu.memory_space<vmem>>, vector<1x1x128x128xbf16>
    %196 = vector.shape_cast %195 : vector<1x1x128x128xbf16> to vector<128x128xbf16>
    %cst_62 = arith.constant dense<0.000000e+00> : vector<16x128xf32>
    %197 = tpu.matmul %194, %196, %cst_62 {dimension_numbers = #tpu.dot_dimension_numbers<[1], [0], [0], [1], [0, 0, 1, 1], [], []>} : vector<16x128xbf16>, vector<128x128xbf16>, vector<16x128xf32> -> vector<16x128xf32>
    %198 = vector.broadcast %42 : vector<1x128xf32> to vector<16x128xf32>
    %199 = arith.addf %197, %198 : vector<16x128xf32>
    %cst_63 = arith.constant 5.000000e-01 : f32
    %200 = vector.broadcast %cst_63 : f32 to vector<16x128xf32>
    %201 = arith.mulf %200, %199 : vector<16x128xf32>
    %cst_64 = arith.constant 4.471500e-02 : f32
    %202 = vector.broadcast %cst_64 : f32 to vector<16x128xf32>
    %203 = arith.mulf %202, %199 : vector<16x128xf32>
    %204 = arith.mulf %203, %199 : vector<16x128xf32>
    %205 = arith.mulf %204, %199 : vector<16x128xf32>
    %206 = arith.addf %199, %205 : vector<16x128xf32>
    %cst_65 = arith.constant 0.797884583 : f32
    %207 = vector.broadcast %cst_65 : f32 to vector<16x128xf32>
    %208 = arith.mulf %207, %206 : vector<16x128xf32>
    %209 = math.tanh %208 : vector<16x128xf32>
    %cst_66 = arith.constant 1.000000e+00 : f32
    %210 = vector.broadcast %cst_66 : f32 to vector<16x128xf32>
    %211 = arith.addf %210, %209 : vector<16x128xf32>
    %212 = arith.mulf %201, %211 : vector<16x128xf32>
    %213 = arith.truncf %212 : vector<16x128xf32> to vector<16x128xbf16>
    %c0_67 = arith.constant 0 : index
    %c1_68 = arith.constant 1 : index
    %c0_69 = arith.constant 0 : index
    %c0_70 = arith.constant 0 : index
    %214 = vector.load %arg3[%c0_67, %c1_68, %c0_69, %c0_70] : memref<2x2x128x128xbf16, #tpu.memory_space<vmem>>, vector<1x1x128x128xbf16>
    %215 = vector.shape_cast %214 : vector<1x1x128x128xbf16> to vector<128x128xbf16>
    %cst_71 = arith.constant dense<0.000000e+00> : vector<16x128xf32>
    %216 = tpu.matmul %213, %215, %cst_71 {dimension_numbers = #tpu.dot_dimension_numbers<[1], [0], [0], [1], [0, 0, 1, 1], [], []>} : vector<16x128xbf16>, vector<128x128xbf16>, vector<16x128xf32> -> vector<16x128xf32>
    %217 = vector.broadcast %43 : vector<1x128xf32> to vector<16x128xf32>
    %218 = arith.addf %216, %217 : vector<16x128xf32>
    %219 = arith.addf %218, %193 : vector<16x128xf32>
    %cst_72 = arith.constant dense<0.000000e+00> : vector<16xf32>
    %220 = vector.multi_reduction <add>, %219, %cst_72 [1] : vector<16x128xf32> to vector<16xf32>
    %221 = vector.shape_cast %220 : vector<16xf32> to vector<16x1xf32>
    %cst_73 = arith.constant 3.125000e-02 : f32
    %222 = vector.broadcast %cst_73 : f32 to vector<16x1xf32>
    %223 = arith.mulf %221, %222 : vector<16x1xf32>
    %224 = vector.broadcast %223 : vector<16x1xf32> to vector<16x128xf32>
    %225 = arith.subf %219, %224 : vector<16x128xf32>
    %226 = vector.broadcast %4 : vector<1x128xf32> to vector<16x128xf32>
    %227 = arith.mulf %225, %226 : vector<16x128xf32>
    %228 = arith.mulf %227, %227 : vector<16x128xf32>
    %cst_74 = arith.constant dense<0.000000e+00> : vector<16xf32>
    %229 = vector.multi_reduction <add>, %228, %cst_74 [1] : vector<16x128xf32> to vector<16xf32>
    %230 = vector.shape_cast %229 : vector<16xf32> to vector<16x1xf32>
    %cst_75 = arith.constant 3.125000e-02 : f32
    %231 = vector.broadcast %cst_75 : f32 to vector<16x1xf32>
    %232 = arith.mulf %230, %231 : vector<16x1xf32>
    %cst_76 = arith.constant 9.99999996E-13 : f32
    %233 = vector.broadcast %cst_76 : f32 to vector<16x1xf32>
    %234 = arith.addf %232, %233 : vector<16x1xf32>
    %235 = math.rsqrt %234 : vector<16x1xf32>
    %236 = vector.broadcast %235 : vector<16x1xf32> to vector<16x128xf32>
    %237 = arith.mulf %227, %236 : vector<16x128xf32>
    %238 = vector.broadcast %44 : vector<1x128xf32> to vector<16x128xf32>
    %239 = arith.mulf %237, %238 : vector<16x128xf32>
    %240 = vector.broadcast %45 : vector<1x128xf32> to vector<16x128xf32>
    %241 = arith.addf %239, %240 : vector<16x128xf32>
    %c1_77 = arith.constant 1 : index
    %c0_78 = arith.constant 0 : index
    %c0_79 = arith.constant 0 : index
    %242 = vector.load %arg4[%c1_77, %c0_78, %c0_79] : memref<2x10x128xf32, #tpu.memory_space<vmem>>, vector<1x10x128xf32>
    %243 = vector.shape_cast %242 : vector<1x10x128xf32> to vector<10x128xf32>
    %244 = vector.extract_strided_slice %243 {offsets = [0, 0], sizes = [1, 128], strides = [1, 1]} : vector<10x128xf32> to vector<1x128xf32>
    %245 = vector.extract_strided_slice %243 {offsets = [1, 0], sizes = [1, 128], strides = [1, 1]} : vector<10x128xf32> to vector<1x128xf32>
    %246 = vector.extract_strided_slice %243 {offsets = [2, 0], sizes = [1, 128], strides = [1, 1]} : vector<10x128xf32> to vector<1x128xf32>
    %247 = vector.extract_strided_slice %243 {offsets = [3, 0], sizes = [1, 128], strides = [1, 1]} : vector<10x128xf32> to vector<1x128xf32>
    %248 = vector.extract_strided_slice %243 {offsets = [4, 0], sizes = [1, 128], strides = [1, 1]} : vector<10x128xf32> to vector<1x128xf32>
    %249 = vector.extract_strided_slice %243 {offsets = [5, 0], sizes = [1, 128], strides = [1, 1]} : vector<10x128xf32> to vector<1x128xf32>
    %250 = vector.extract_strided_slice %243 {offsets = [6, 0], sizes = [1, 128], strides = [1, 1]} : vector<10x128xf32> to vector<1x128xf32>
    %251 = vector.extract_strided_slice %243 {offsets = [7, 0], sizes = [1, 128], strides = [1, 1]} : vector<10x128xf32> to vector<1x128xf32>
    %252 = vector.extract_strided_slice %243 {offsets = [8, 0], sizes = [1, 128], strides = [1, 1]} : vector<10x128xf32> to vector<1x128xf32>
    %253 = vector.extract_strided_slice %243 {offsets = [9, 0], sizes = [1, 128], strides = [1, 1]} : vector<10x128xf32> to vector<1x128xf32>
    %254 = arith.truncf %241 : vector<16x128xf32> to vector<16x128xbf16>
    %c1_80 = arith.constant 1 : index
    %c0_81 = arith.constant 0 : index
    %c0_82 = arith.constant 0 : index
    %c0_83 = arith.constant 0 : index
    %255 = vector.load %arg2[%c1_80, %c0_81, %c0_82, %c0_83] : memref<2x4x128x128xbf16, #tpu.memory_space<vmem>>, vector<1x1x128x128xbf16>
    %256 = vector.shape_cast %255 : vector<1x1x128x128xbf16> to vector<128x128xbf16>
    %cst_84 = arith.constant dense<0.000000e+00> : vector<16x128xf32>
    %257 = tpu.matmul %254, %256, %cst_84 {dimension_numbers = #tpu.dot_dimension_numbers<[1], [0], [0], [1], [0, 0, 1, 1], [], []>} : vector<16x128xbf16>, vector<128x128xbf16>, vector<16x128xf32> -> vector<16x128xf32>
    %258 = vector.broadcast %244 : vector<1x128xf32> to vector<16x128xf32>
    %259 = arith.addf %257, %258 : vector<16x128xf32>
    %c1_85 = arith.constant 1 : index
    %c1_86 = arith.constant 1 : index
    %c0_87 = arith.constant 0 : index
    %c0_88 = arith.constant 0 : index
    %260 = vector.load %arg2[%c1_85, %c1_86, %c0_87, %c0_88] : memref<2x4x128x128xbf16, #tpu.memory_space<vmem>>, vector<1x1x128x128xbf16>
    %261 = vector.shape_cast %260 : vector<1x1x128x128xbf16> to vector<128x128xbf16>
    %cst_89 = arith.constant dense<0.000000e+00> : vector<16x128xf32>
    %262 = tpu.matmul %254, %261, %cst_89 {dimension_numbers = #tpu.dot_dimension_numbers<[1], [0], [0], [1], [0, 0, 1, 1], [], []>} : vector<16x128xbf16>, vector<128x128xbf16>, vector<16x128xf32> -> vector<16x128xf32>
    %263 = vector.broadcast %245 : vector<1x128xf32> to vector<16x128xf32>
    %264 = arith.addf %262, %263 : vector<16x128xf32>
    %c1_90 = arith.constant 1 : index
    %c2_91 = arith.constant 2 : index
    %c0_92 = arith.constant 0 : index
    %c0_93 = arith.constant 0 : index
    %265 = vector.load %arg2[%c1_90, %c2_91, %c0_92, %c0_93] : memref<2x4x128x128xbf16, #tpu.memory_space<vmem>>, vector<1x1x128x128xbf16>
    %266 = vector.shape_cast %265 : vector<1x1x128x128xbf16> to vector<128x128xbf16>
    %cst_94 = arith.constant dense<0.000000e+00> : vector<16x128xf32>
    %267 = tpu.matmul %254, %266, %cst_94 {dimension_numbers = #tpu.dot_dimension_numbers<[1], [0], [0], [1], [0, 0, 1, 1], [], []>} : vector<16x128xbf16>, vector<128x128xbf16>, vector<16x128xf32> -> vector<16x128xf32>
    %268 = vector.broadcast %246 : vector<1x128xf32> to vector<16x128xf32>
    %269 = arith.addf %267, %268 : vector<16x128xf32>
    %c1_95 = arith.constant 1 : index
    %c3_96 = arith.constant 3 : index
    %c0_97 = arith.constant 0 : index
    %c0_98 = arith.constant 0 : index
    %270 = vector.load %arg2[%c1_95, %c3_96, %c0_97, %c0_98] : memref<2x4x128x128xbf16, #tpu.memory_space<vmem>>, vector<1x1x128x128xbf16>
    %271 = vector.shape_cast %270 : vector<1x1x128x128xbf16> to vector<128x128xbf16>
    %cst_99 = arith.constant 0.000000e+00 : f32
    %272 = vector.broadcast %cst_99 : f32 to vector<16x128xf32>
    %273 = vector.extract_strided_slice %259 {offsets = [0, 0], sizes = [16, 8], strides = [1, 1]} : vector<16x128xf32> to vector<16x8xf32>
    %274 = arith.truncf %273 : vector<16x8xf32> to vector<16x8xbf16>
    %275 = vector.extract_strided_slice %264 {offsets = [0, 0], sizes = [16, 8], strides = [1, 1]} : vector<16x128xf32> to vector<16x8xf32>
    %276 = arith.truncf %275 : vector<16x8xf32> to vector<16x8xbf16>
    %277 = vector.extract_strided_slice %269 {offsets = [0, 0], sizes = [16, 8], strides = [1, 1]} : vector<16x128xf32> to vector<16x8xf32>
    %278 = arith.truncf %277 : vector<16x8xf32> to vector<16x8xbf16>
    %cst_100 = arith.constant dense<0.000000e+00> : vector<16x16xf32>
    %279 = tpu.matmul %274, %276, %cst_100 {dimension_numbers = #tpu.dot_dimension_numbers<[1], [1], [0], [0], [0, 0, 1, 0], [], []>} : vector<16x8xbf16>, vector<16x8xbf16>, vector<16x16xf32> -> vector<16x16xf32>
    %cst_101 = arith.constant 0.353553385 : f32
    %280 = vector.broadcast %cst_101 : f32 to vector<16x16xf32>
    %281 = arith.mulf %279, %280 : vector<16x16xf32>
    %282 = arith.addf %281, %5 : vector<16x16xf32>
    %cst_102 = arith.constant dense<0xFF800000> : vector<16xf32>
    %283 = vector.multi_reduction <maximumf>, %282, %cst_102 [1] : vector<16x16xf32> to vector<16xf32>
    %284 = vector.shape_cast %283 : vector<16xf32> to vector<16x1xf32>
    %285 = vector.broadcast %284 : vector<16x1xf32> to vector<16x16xf32>
    %286 = arith.subf %282, %285 : vector<16x16xf32>
    %287 = math.exp %286 : vector<16x16xf32>
    %cst_103 = arith.constant dense<0.000000e+00> : vector<16xf32>
    %288 = vector.multi_reduction <add>, %287, %cst_103 [1] : vector<16x16xf32> to vector<16xf32>
    %289 = vector.shape_cast %288 : vector<16xf32> to vector<16x1xf32>
    %290 = tpu.reciprocal %289 {approx = true} : vector<16x1xf32> -> vector<16x1xf32>
    %291 = vector.broadcast %290 : vector<16x1xf32> to vector<16x16xf32>
    %292 = arith.mulf %287, %291 : vector<16x16xf32>
    %293 = arith.truncf %292 : vector<16x16xf32> to vector<16x16xbf16>
    %cst_104 = arith.constant dense<0.000000e+00> : vector<16x8xf32>
    %294 = tpu.matmul %293, %278, %cst_104 {dimension_numbers = #tpu.dot_dimension_numbers<[1], [0], [0], [1], [0, 0, 1, 1], [], []>} : vector<16x16xbf16>, vector<16x8xbf16>, vector<16x8xf32> -> vector<16x8xf32>
    %295 = arith.truncf %294 : vector<16x8xf32> to vector<16x8xbf16>
    %296 = vector.extract_strided_slice %271 {offsets = [0, 0], sizes = [8, 128], strides = [1, 1]} : vector<128x128xbf16> to vector<8x128xbf16>
    %cst_105 = arith.constant dense<0.000000e+00> : vector<16x128xf32>
    %297 = tpu.matmul %295, %296, %cst_105 {dimension_numbers = #tpu.dot_dimension_numbers<[1], [0], [0], [1], [0, 0, 1, 1], [], []>} : vector<16x8xbf16>, vector<8x128xbf16>, vector<16x128xf32> -> vector<16x128xf32>
    %298 = arith.addf %272, %297 : vector<16x128xf32>
    %299 = vector.extract_strided_slice %259 {offsets = [0, 8], sizes = [16, 8], strides = [1, 1]} : vector<16x128xf32> to vector<16x8xf32>
    %300 = arith.truncf %299 : vector<16x8xf32> to vector<16x8xbf16>
    %301 = vector.extract_strided_slice %264 {offsets = [0, 8], sizes = [16, 8], strides = [1, 1]} : vector<16x128xf32> to vector<16x8xf32>
    %302 = arith.truncf %301 : vector<16x8xf32> to vector<16x8xbf16>
    %303 = vector.extract_strided_slice %269 {offsets = [0, 8], sizes = [16, 8], strides = [1, 1]} : vector<16x128xf32> to vector<16x8xf32>
    %304 = arith.truncf %303 : vector<16x8xf32> to vector<16x8xbf16>
    %cst_106 = arith.constant dense<0.000000e+00> : vector<16x16xf32>
    %305 = tpu.matmul %300, %302, %cst_106 {dimension_numbers = #tpu.dot_dimension_numbers<[1], [1], [0], [0], [0, 0, 1, 0], [], []>} : vector<16x8xbf16>, vector<16x8xbf16>, vector<16x16xf32> -> vector<16x16xf32>
    %cst_107 = arith.constant 0.353553385 : f32
    %306 = vector.broadcast %cst_107 : f32 to vector<16x16xf32>
    %307 = arith.mulf %305, %306 : vector<16x16xf32>
    %308 = arith.addf %307, %5 : vector<16x16xf32>
    %cst_108 = arith.constant dense<0xFF800000> : vector<16xf32>
    %309 = vector.multi_reduction <maximumf>, %308, %cst_108 [1] : vector<16x16xf32> to vector<16xf32>
    %310 = vector.shape_cast %309 : vector<16xf32> to vector<16x1xf32>
    %311 = vector.broadcast %310 : vector<16x1xf32> to vector<16x16xf32>
    %312 = arith.subf %308, %311 : vector<16x16xf32>
    %313 = math.exp %312 : vector<16x16xf32>
    %cst_109 = arith.constant dense<0.000000e+00> : vector<16xf32>
    %314 = vector.multi_reduction <add>, %313, %cst_109 [1] : vector<16x16xf32> to vector<16xf32>
    %315 = vector.shape_cast %314 : vector<16xf32> to vector<16x1xf32>
    %316 = tpu.reciprocal %315 {approx = true} : vector<16x1xf32> -> vector<16x1xf32>
    %317 = vector.broadcast %316 : vector<16x1xf32> to vector<16x16xf32>
    %318 = arith.mulf %313, %317 : vector<16x16xf32>
    %319 = arith.truncf %318 : vector<16x16xf32> to vector<16x16xbf16>
    %cst_110 = arith.constant dense<0.000000e+00> : vector<16x8xf32>
    %320 = tpu.matmul %319, %304, %cst_110 {dimension_numbers = #tpu.dot_dimension_numbers<[1], [0], [0], [1], [0, 0, 1, 1], [], []>} : vector<16x16xbf16>, vector<16x8xbf16>, vector<16x8xf32> -> vector<16x8xf32>
    %321 = arith.truncf %320 : vector<16x8xf32> to vector<16x8xbf16>
    %322 = vector.extract_strided_slice %271 {offsets = [8, 0], sizes = [8, 128], strides = [1, 1]} : vector<128x128xbf16> to vector<8x128xbf16>
    %cst_111 = arith.constant dense<0.000000e+00> : vector<16x128xf32>
    %323 = tpu.matmul %321, %322, %cst_111 {dimension_numbers = #tpu.dot_dimension_numbers<[1], [0], [0], [1], [0, 0, 1, 1], [], []>} : vector<16x8xbf16>, vector<8x128xbf16>, vector<16x128xf32> -> vector<16x128xf32>
    %324 = arith.addf %298, %323 : vector<16x128xf32>
    %325 = vector.extract_strided_slice %259 {offsets = [0, 16], sizes = [16, 8], strides = [1, 1]} : vector<16x128xf32> to vector<16x8xf32>
    %326 = arith.truncf %325 : vector<16x8xf32> to vector<16x8xbf16>
    %327 = vector.extract_strided_slice %264 {offsets = [0, 16], sizes = [16, 8], strides = [1, 1]} : vector<16x128xf32> to vector<16x8xf32>
    %328 = arith.truncf %327 : vector<16x8xf32> to vector<16x8xbf16>
    %329 = vector.extract_strided_slice %269 {offsets = [0, 16], sizes = [16, 8], strides = [1, 1]} : vector<16x128xf32> to vector<16x8xf32>
    %330 = arith.truncf %329 : vector<16x8xf32> to vector<16x8xbf16>
    %cst_112 = arith.constant dense<0.000000e+00> : vector<16x16xf32>
    %331 = tpu.matmul %326, %328, %cst_112 {dimension_numbers = #tpu.dot_dimension_numbers<[1], [1], [0], [0], [0, 0, 1, 0], [], []>} : vector<16x8xbf16>, vector<16x8xbf16>, vector<16x16xf32> -> vector<16x16xf32>
    %cst_113 = arith.constant 0.353553385 : f32
    %332 = vector.broadcast %cst_113 : f32 to vector<16x16xf32>
    %333 = arith.mulf %331, %332 : vector<16x16xf32>
    %334 = arith.addf %333, %5 : vector<16x16xf32>
    %cst_114 = arith.constant dense<0xFF800000> : vector<16xf32>
    %335 = vector.multi_reduction <maximumf>, %334, %cst_114 [1] : vector<16x16xf32> to vector<16xf32>
    %336 = vector.shape_cast %335 : vector<16xf32> to vector<16x1xf32>
    %337 = vector.broadcast %336 : vector<16x1xf32> to vector<16x16xf32>
    %338 = arith.subf %334, %337 : vector<16x16xf32>
    %339 = math.exp %338 : vector<16x16xf32>
    %cst_115 = arith.constant dense<0.000000e+00> : vector<16xf32>
    %340 = vector.multi_reduction <add>, %339, %cst_115 [1] : vector<16x16xf32> to vector<16xf32>
    %341 = vector.shape_cast %340 : vector<16xf32> to vector<16x1xf32>
    %342 = tpu.reciprocal %341 {approx = true} : vector<16x1xf32> -> vector<16x1xf32>
    %343 = vector.broadcast %342 : vector<16x1xf32> to vector<16x16xf32>
    %344 = arith.mulf %339, %343 : vector<16x16xf32>
    %345 = arith.truncf %344 : vector<16x16xf32> to vector<16x16xbf16>
    %cst_116 = arith.constant dense<0.000000e+00> : vector<16x8xf32>
    %346 = tpu.matmul %345, %330, %cst_116 {dimension_numbers = #tpu.dot_dimension_numbers<[1], [0], [0], [1], [0, 0, 1, 1], [], []>} : vector<16x16xbf16>, vector<16x8xbf16>, vector<16x8xf32> -> vector<16x8xf32>
    %347 = arith.truncf %346 : vector<16x8xf32> to vector<16x8xbf16>
    %348 = vector.extract_strided_slice %271 {offsets = [16, 0], sizes = [8, 128], strides = [1, 1]} : vector<128x128xbf16> to vector<8x128xbf16>
    %cst_117 = arith.constant dense<0.000000e+00> : vector<16x128xf32>
    %349 = tpu.matmul %347, %348, %cst_117 {dimension_numbers = #tpu.dot_dimension_numbers<[1], [0], [0], [1], [0, 0, 1, 1], [], []>} : vector<16x8xbf16>, vector<8x128xbf16>, vector<16x128xf32> -> vector<16x128xf32>
    %350 = arith.addf %324, %349 : vector<16x128xf32>
    %351 = vector.extract_strided_slice %259 {offsets = [0, 24], sizes = [16, 8], strides = [1, 1]} : vector<16x128xf32> to vector<16x8xf32>
    %352 = arith.truncf %351 : vector<16x8xf32> to vector<16x8xbf16>
    %353 = vector.extract_strided_slice %264 {offsets = [0, 24], sizes = [16, 8], strides = [1, 1]} : vector<16x128xf32> to vector<16x8xf32>
    %354 = arith.truncf %353 : vector<16x8xf32> to vector<16x8xbf16>
    %355 = vector.extract_strided_slice %269 {offsets = [0, 24], sizes = [16, 8], strides = [1, 1]} : vector<16x128xf32> to vector<16x8xf32>
    %356 = arith.truncf %355 : vector<16x8xf32> to vector<16x8xbf16>
    %cst_118 = arith.constant dense<0.000000e+00> : vector<16x16xf32>
    %357 = tpu.matmul %352, %354, %cst_118 {dimension_numbers = #tpu.dot_dimension_numbers<[1], [1], [0], [0], [0, 0, 1, 0], [], []>} : vector<16x8xbf16>, vector<16x8xbf16>, vector<16x16xf32> -> vector<16x16xf32>
    %cst_119 = arith.constant 0.353553385 : f32
    %358 = vector.broadcast %cst_119 : f32 to vector<16x16xf32>
    %359 = arith.mulf %357, %358 : vector<16x16xf32>
    %360 = arith.addf %359, %5 : vector<16x16xf32>
    %cst_120 = arith.constant dense<0xFF800000> : vector<16xf32>
    %361 = vector.multi_reduction <maximumf>, %360, %cst_120 [1] : vector<16x16xf32> to vector<16xf32>
    %362 = vector.shape_cast %361 : vector<16xf32> to vector<16x1xf32>
    %363 = vector.broadcast %362 : vector<16x1xf32> to vector<16x16xf32>
    %364 = arith.subf %360, %363 : vector<16x16xf32>
    %365 = math.exp %364 : vector<16x16xf32>
    %cst_121 = arith.constant dense<0.000000e+00> : vector<16xf32>
    %366 = vector.multi_reduction <add>, %365, %cst_121 [1] : vector<16x16xf32> to vector<16xf32>
    %367 = vector.shape_cast %366 : vector<16xf32> to vector<16x1xf32>
    %368 = tpu.reciprocal %367 {approx = true} : vector<16x1xf32> -> vector<16x1xf32>
    %369 = vector.broadcast %368 : vector<16x1xf32> to vector<16x16xf32>
    %370 = arith.mulf %365, %369 : vector<16x16xf32>
    %371 = arith.truncf %370 : vector<16x16xf32> to vector<16x16xbf16>
    %cst_122 = arith.constant dense<0.000000e+00> : vector<16x8xf32>
    %372 = tpu.matmul %371, %356, %cst_122 {dimension_numbers = #tpu.dot_dimension_numbers<[1], [0], [0], [1], [0, 0, 1, 1], [], []>} : vector<16x16xbf16>, vector<16x8xbf16>, vector<16x8xf32> -> vector<16x8xf32>
    %373 = arith.truncf %372 : vector<16x8xf32> to vector<16x8xbf16>
    %374 = vector.extract_strided_slice %271 {offsets = [24, 0], sizes = [8, 128], strides = [1, 1]} : vector<128x128xbf16> to vector<8x128xbf16>
    %cst_123 = arith.constant dense<0.000000e+00> : vector<16x128xf32>
    %375 = tpu.matmul %373, %374, %cst_123 {dimension_numbers = #tpu.dot_dimension_numbers<[1], [0], [0], [1], [0, 0, 1, 1], [], []>} : vector<16x8xbf16>, vector<8x128xbf16>, vector<16x128xf32> -> vector<16x128xf32>
    %376 = arith.addf %350, %375 : vector<16x128xf32>
    %377 = vector.broadcast %247 : vector<1x128xf32> to vector<16x128xf32>
    %378 = arith.addf %376, %377 : vector<16x128xf32>
    %379 = arith.addf %378, %241 : vector<16x128xf32>
    %cst_124 = arith.constant dense<0.000000e+00> : vector<16xf32>
    %380 = vector.multi_reduction <add>, %379, %cst_124 [1] : vector<16x128xf32> to vector<16xf32>
    %381 = vector.shape_cast %380 : vector<16xf32> to vector<16x1xf32>
    %cst_125 = arith.constant 3.125000e-02 : f32
    %382 = vector.broadcast %cst_125 : f32 to vector<16x1xf32>
    %383 = arith.mulf %381, %382 : vector<16x1xf32>
    %384 = vector.broadcast %383 : vector<16x1xf32> to vector<16x128xf32>
    %385 = arith.subf %379, %384 : vector<16x128xf32>
    %386 = vector.broadcast %4 : vector<1x128xf32> to vector<16x128xf32>
    %387 = arith.mulf %385, %386 : vector<16x128xf32>
    %388 = arith.mulf %387, %387 : vector<16x128xf32>
    %cst_126 = arith.constant dense<0.000000e+00> : vector<16xf32>
    %389 = vector.multi_reduction <add>, %388, %cst_126 [1] : vector<16x128xf32> to vector<16xf32>
    %390 = vector.shape_cast %389 : vector<16xf32> to vector<16x1xf32>
    %cst_127 = arith.constant 3.125000e-02 : f32
    %391 = vector.broadcast %cst_127 : f32 to vector<16x1xf32>
    %392 = arith.mulf %390, %391 : vector<16x1xf32>
    %cst_128 = arith.constant 9.99999996E-13 : f32
    %393 = vector.broadcast %cst_128 : f32 to vector<16x1xf32>
    %394 = arith.addf %392, %393 : vector<16x1xf32>
    %395 = math.rsqrt %394 : vector<16x1xf32>
    %396 = vector.broadcast %395 : vector<16x1xf32> to vector<16x128xf32>
    %397 = arith.mulf %387, %396 : vector<16x128xf32>
    %398 = vector.broadcast %248 : vector<1x128xf32> to vector<16x128xf32>
    %399 = arith.mulf %397, %398 : vector<16x128xf32>
    %400 = vector.broadcast %249 : vector<1x128xf32> to vector<16x128xf32>
    %401 = arith.addf %399, %400 : vector<16x128xf32>
    %402 = arith.truncf %401 : vector<16x128xf32> to vector<16x128xbf16>
    %c1_129 = arith.constant 1 : index
    %c0_130 = arith.constant 0 : index
    %c0_131 = arith.constant 0 : index
    %c0_132 = arith.constant 0 : index
    %403 = vector.load %arg3[%c1_129, %c0_130, %c0_131, %c0_132] : memref<2x2x128x128xbf16, #tpu.memory_space<vmem>>, vector<1x1x128x128xbf16>
    %404 = vector.shape_cast %403 : vector<1x1x128x128xbf16> to vector<128x128xbf16>
    %cst_133 = arith.constant dense<0.000000e+00> : vector<16x128xf32>
    %405 = tpu.matmul %402, %404, %cst_133 {dimension_numbers = #tpu.dot_dimension_numbers<[1], [0], [0], [1], [0, 0, 1, 1], [], []>} : vector<16x128xbf16>, vector<128x128xbf16>, vector<16x128xf32> -> vector<16x128xf32>
    %406 = vector.broadcast %250 : vector<1x128xf32> to vector<16x128xf32>
    %407 = arith.addf %405, %406 : vector<16x128xf32>
    %cst_134 = arith.constant 5.000000e-01 : f32
    %408 = vector.broadcast %cst_134 : f32 to vector<16x128xf32>
    %409 = arith.mulf %408, %407 : vector<16x128xf32>
    %cst_135 = arith.constant 4.471500e-02 : f32
    %410 = vector.broadcast %cst_135 : f32 to vector<16x128xf32>
    %411 = arith.mulf %410, %407 : vector<16x128xf32>
    %412 = arith.mulf %411, %407 : vector<16x128xf32>
    %413 = arith.mulf %412, %407 : vector<16x128xf32>
    %414 = arith.addf %407, %413 : vector<16x128xf32>
    %cst_136 = arith.constant 0.797884583 : f32
    %415 = vector.broadcast %cst_136 : f32 to vector<16x128xf32>
    %416 = arith.mulf %415, %414 : vector<16x128xf32>
    %417 = math.tanh %416 : vector<16x128xf32>
    %cst_137 = arith.constant 1.000000e+00 : f32
    %418 = vector.broadcast %cst_137 : f32 to vector<16x128xf32>
    %419 = arith.addf %418, %417 : vector<16x128xf32>
    %420 = arith.mulf %409, %419 : vector<16x128xf32>
    %421 = arith.truncf %420 : vector<16x128xf32> to vector<16x128xbf16>
    %c1_138 = arith.constant 1 : index
    %c1_139 = arith.constant 1 : index
    %c0_140 = arith.constant 0 : index
    %c0_141 = arith.constant 0 : index
    %422 = vector.load %arg3[%c1_138, %c1_139, %c0_140, %c0_141] : memref<2x2x128x128xbf16, #tpu.memory_space<vmem>>, vector<1x1x128x128xbf16>
    %423 = vector.shape_cast %422 : vector<1x1x128x128xbf16> to vector<128x128xbf16>
    %cst_142 = arith.constant dense<0.000000e+00> : vector<16x128xf32>
    %424 = tpu.matmul %421, %423, %cst_142 {dimension_numbers = #tpu.dot_dimension_numbers<[1], [0], [0], [1], [0, 0, 1, 1], [], []>} : vector<16x128xbf16>, vector<128x128xbf16>, vector<16x128xf32> -> vector<16x128xf32>
    %425 = vector.broadcast %251 : vector<1x128xf32> to vector<16x128xf32>
    %426 = arith.addf %424, %425 : vector<16x128xf32>
    %427 = arith.addf %426, %401 : vector<16x128xf32>
    %cst_143 = arith.constant dense<0.000000e+00> : vector<16xf32>
    %428 = vector.multi_reduction <add>, %427, %cst_143 [1] : vector<16x128xf32> to vector<16xf32>
    %429 = vector.shape_cast %428 : vector<16xf32> to vector<16x1xf32>
    %cst_144 = arith.constant 3.125000e-02 : f32
    %430 = vector.broadcast %cst_144 : f32 to vector<16x1xf32>
    %431 = arith.mulf %429, %430 : vector<16x1xf32>
    %432 = vector.broadcast %431 : vector<16x1xf32> to vector<16x128xf32>
    %433 = arith.subf %427, %432 : vector<16x128xf32>
    %434 = vector.broadcast %4 : vector<1x128xf32> to vector<16x128xf32>
    %435 = arith.mulf %433, %434 : vector<16x128xf32>
    %436 = arith.mulf %435, %435 : vector<16x128xf32>
    %cst_145 = arith.constant dense<0.000000e+00> : vector<16xf32>
    %437 = vector.multi_reduction <add>, %436, %cst_145 [1] : vector<16x128xf32> to vector<16xf32>
    %438 = vector.shape_cast %437 : vector<16xf32> to vector<16x1xf32>
    %cst_146 = arith.constant 3.125000e-02 : f32
    %439 = vector.broadcast %cst_146 : f32 to vector<16x1xf32>
    %440 = arith.mulf %438, %439 : vector<16x1xf32>
    %cst_147 = arith.constant 9.99999996E-13 : f32
    %441 = vector.broadcast %cst_147 : f32 to vector<16x1xf32>
    %442 = arith.addf %440, %441 : vector<16x1xf32>
    %443 = math.rsqrt %442 : vector<16x1xf32>
    %444 = vector.broadcast %443 : vector<16x1xf32> to vector<16x128xf32>
    %445 = arith.mulf %435, %444 : vector<16x128xf32>
    %446 = vector.broadcast %252 : vector<1x128xf32> to vector<16x128xf32>
    %447 = arith.mulf %445, %446 : vector<16x128xf32>
    %448 = vector.broadcast %253 : vector<1x128xf32> to vector<16x128xf32>
    %449 = arith.addf %447, %448 : vector<16x128xf32>
    %450 = vector.extract_strided_slice %449 {offsets = [0, 0], sizes = [1, 128], strides = [1, 1]} : vector<16x128xf32> to vector<1x128xf32>
    %451 = vector.extract_strided_slice %449 {offsets = [8, 0], sizes = [1, 128], strides = [1, 1]} : vector<16x128xf32> to vector<1x128xf32>
    %452 = tpu.concatenate %450, %451 in 0 : vector<1x128xf32>, vector<1x128xf32> -> vector<2x128xf32>
    %c0_148 = arith.constant 0 : index
    %c0_149 = arith.constant 0 : index
    %453 = vector.load %arg7[%c0_148, %c0_149] : memref<2x128xf32, #tpu.memory_space<vmem>>, vector<2x128xf32>
    tpu.vector_store %arg7[%c0_148, %c0_149], %452 {strides = array<i32>} : memref<2x128xf32, #tpu.memory_space<vmem>>, vector<2x128xf32>,
    %454 = vector.broadcast %9 : vector<1x128xf32> to vector<2x128xf32>
    %455 = arith.mulf %452, %454 : vector<2x128xf32>
    %cst_150 = arith.constant dense<0.000000e+00> : vector<2xf32>
    %456 = vector.multi_reduction <add>, %455, %cst_150 [1] : vector<2x128xf32> to vector<2xf32>
    %457 = vector.shape_cast %456 : vector<2xf32> to vector<2x1xf32>
    %458 = vector.broadcast %10 : vector<1x1xf32> to vector<2x1xf32>
    %459 = arith.addf %457, %458 : vector<2x1xf32>
    %c0_151 = arith.constant 0 : index
    %c0_152 = arith.constant 0 : index
    %460 = vector.load %arg6[%c0_151, %c0_152] : memref<2x1xf32, #tpu.memory_space<vmem>>, vector<2x1xf32>
    tpu.vector_store %arg6[%c0_151, %c0_152], %459 {strides = array<i32>} : memref<2x1xf32, #tpu.memory_space<vmem>>, vector<2x1xf32>,
    return
  }
}

</mosaic_0001>

<bundles_post_ra>
// kernel: bert_forward.1
= control target key start
LH: loop header
LB: loop body
LE: loop exit
PB: predicated region body
PF: predicated region fallthrough
CT: control target
= control target key end

     0   :  { %s3171_s0 = inlined_call_operand.vmem [shape: f32[16,128], index: 0, kind: input, shape index: {}]   ;;  %s3172_s1 = inlined_call_operand.vmem [shape: f32[16,16], index: 1, kind: input, shape index: {}]   ;;  %s3173_s2 = inlined_call_operand.vmem [shape: bf16[2,4,128,128], index: 2, kind: input, shape index: {}]   ;;  %s3174_s3 = inlined_call_operand.vmem [shape: bf16[2,2,128,128], index: 3, kind: input, shape index: {}]   ;;  %s3175_s4 = inlined_call_operand.vmem [shape: f32[2,10,128], index: 4, kind: input, shape index: {}]   ;;  %s3176_s5 = inlined_call_operand.vmem [shape: f32[4,128], index: 5, kind: input, shape index: {}]   ;;  %s3177_s6 = inlined_call_operand.vmem [shape: f32[2,1], index: 6, kind: output, shape index: {0}]   ;;  %s3178_s7 = inlined_call_operand.hbm [shape: f32[2,128], index: 7, kind: output, shape index: {1}]  }
   0x1   :  { %v35_v0 = vld [vmem:[%s3171_s0] sm:$0xff] }
   0x2   :  { %13 = vsyncpa [#allocation3], 0  ;;  %37 = vadd.xlane.f32.xlu0 %v35_v0  ;;  %v36_v1 = vld [vmem:[%s3171_s0 + $0x8] sm:$0xff]  ;;  %v27_v2 = vlaneseq  ;;  %v2616_v6 = vmov 0.0   ;;  %v2417_v16 = vld [vmem:[%s3173_s2 + $0x38] sm:$0xff]  ;;  %vm335_vm7 = vcmask 64512  }
   0x3   :  { %v2425_v17 = vld [vmem:[%s3173_s2 + $0x78] sm:$0xff]  ;;  %153 = vmatpush.bf16.msra.mxu0 %v2417_v16  ;;  %v2416_v19 = vld [vmem:[%s3173_s2 + $0x30] sm:$0xff]  ;;  %v2415_v22 = vld [vmem:[%s3173_s2 + $0x28] sm:$0xff]  ;;  %vm360_vm8 = vcmask 130048   ;;  %s2617_s12 = smov 120   ;;  %s2618_s13 = smov 112  }
   0x4   :  { %v28_v3 = vand.u32 127, %v27_v2  ;;  %v2433_v18 = vld [vmem:[%s3173_s2 + $0xb8] sm:$0xff]  ;;  %233 = vmatpush.bf16.msra.mxu1 %v2425_v17  ;;  %v2424_v20 = vld [vmem:[%s3173_s2 + $0x70] sm:$0xff]  ;;  %v2423_v23 = vld [vmem:[%s3173_s2 + $0x68] sm:$0xff]  ;;  %s2619_s14 = smov 104   ;;  %vm480_vm9 = vcmask 1043456  }
   0x5   :  { %313 = vmatpush.bf16.msra.mxu2 %v2433_v18  ;;  %v2432_v21 = vld [vmem:[%s3173_s2 + $0xb0] sm:$0xff]  ;;  %v2431_v24 = vld [vmem:[%s3173_s2 + $0xa8] sm:$0xff]  ;;  %v2414_v25 = vld [vmem:[%s3173_s2 + $0x20] sm:$0xff]  ;;  %s2620_s16 = smov [#allocation2]   ;;  %s1916_s19 = sshll.u32 %s3178_s7, 4  ;;  %s1917_s19 = int_to_ptr.hbm [resolvable:$true] %s1916_s19 }
   0x6   :  { %vm29_vm0 = vcmp.lt.s32.totalorder %v28_v3, 32  ;;  %v2422_v26 = vld [vmem:[%s3173_s2 + $0x60] sm:$0xff]  ;;  %v2413_v28 = vld [vmem:[%s3173_s2 + $0x18] sm:$0xff]  ;;  %v2412_v31 = vld [vmem:[%s3173_s2 + $0x10] sm:$0xff]  ;;  %s1914_s17 = sshll.u32 %s2620_s16, 4  ;;  %s1915_s17 = int_to_ptr.vmem [resolvable:$true] %s1914_s17 }
   0x7   :  { %v2667_v7 = vsel %vm29_vm0, 1.0, %v2616_v6  ;;  %154 = vmatpush.bf16.msra.mxu0 %v2416_v19  ;;  %v2430_v27 = vld [vmem:[%s3173_s2 + $0xa0] sm:$0xff]  ;;  %v2421_v29 = vld [vmem:[%s3173_s2 + $0x58] sm:$0xff]  ;;  %v2420_v32 = vld [vmem:[%s3173_s2 + $0x50] sm:$0xff] }
   0x8   :  { %234 = vmatpush.bf16.msra.mxu1 %v2424_v20  ;;  %v2429_v30 = vld [vmem:[%s3173_s2 + $0x98] sm:$0xff]  ;;  %v2428_v33 = vld [vmem:[%s3173_s2 + $0x90] sm:$0xff]  ;;  %v2411_v34 = vld [vmem:[%s3173_s2 + $0x8] sm:$0xff] }
   0x9   :  { %314 = vmatpush.bf16.msra.mxu2 %v2432_v21  ;;  %v2419_v35 = vld [vmem:[%s3173_s2 + $0x48] sm:$0xff]  ;;  %v2410_v38 = vld [vmem:[%s3173_s2] sm:$0xff] }
   0xa   :  { %39 = vadd.xlane.f32.xlu0 %v36_v1  ;;  %v2427_v36 = vld [vmem:[%s3173_s2 + $0x88] sm:$0xff]  ;;  %v2418_v39 = vld [vmem:[%s3173_s2 + $0x40] sm:$0xff] }
   0xb   :  { %155 = vmatpush.bf16.msra.mxu0 %v2415_v22  ;;  %v2426_v41 = vld [vmem:[%s3173_s2 + $0x80] sm:$0xff] }
   0xc   :  { %235 = vmatpush.bf16.msra.mxu1 %v2423_v23  ;;  %v34_v57 = vld [vmem:[%s3176_s5] sm:$0xf] }
   0xd   :  { %315 = vmatpush.bf16.msra.mxu2 %v2431_v24  ;;  %v79_v60 = vperm.slane %v34_v57, 0 }
   0xf   :  { %156 = vmatpush.bf16.msra.mxu0 %v2414_v25 }
  0x10   :  { %236 = vmatpush.bf16.msra.mxu1 %v2422_v26 }
  0x11   :  { %316 = vmatpush.bf16.msra.mxu2 %v2430_v27 }
  0x13   :  { %157 = vmatpush.bf16.msra.mxu0 %v2413_v28  ;;  %v2778_v28 = vld [vmem:[%s3172_s1] sm:$0xff] }
  0x14   :  { %237 = vmatpush.bf16.msra.mxu1 %v2421_v29 }
  0x15   :  { %317 = vmatpush.bf16.msra.mxu2 %v2429_v30 }
  0x17   :  { %158 = vmatpush.bf16.msra.mxu0 %v2412_v31 }
  0x18   :  { %238 = vmatpush.bf16.msra.mxu1 %v2420_v32 }
  0x19   :  { %318 = vmatpush.bf16.msra.mxu2 %v2428_v33  ;;  %v2785_v33 = vld [vmem:[%s3172_s1 + $0x8] sm:$0xff] }
  0x1b   :  { %159 = vmatpush.bf16.msra.mxu0 %v2411_v34 }
  0x1c   :  { %239 = vmatpush.bf16.msra.mxu1 %v2419_v35 }
  0x1d   :  { %319 = vmatpush.bf16.msra.mxu2 %v2427_v36 }
  0x1f   :  { %160 = vmatpush.bf16.msra.mxu0 %v2410_v38 }
  0x20   :  { %240 = vmatpush.bf16.msra.mxu1 %v2418_v39 }
  0x21   :  { %320 = vmatpush.bf16.msra.mxu2 %v2426_v41 }
  0x75   :  { %v38_v4 = vpop.xlane.xlu0 %37 }
  0x76   :  { %v41_v5 = vmul.f32 0.03125, %v38_v4 }
  0x78   :  { %v43_v8 = vsub.f32 %v35_v0, %v41_v5 }
  0x7a   :  { %v2670_v9 = vmul.f32 %v2667_v7, %v43_v8  ;;  %v2765_v8 = vld [vmem:[%s3175_s4] sm:$0xff] }
  0x7b   :  { %v264_v16 = vperm.slane %v2765_v8, 2  ;;  %v104_v18 = vperm.slane %v2765_v8, 0 }
  0x7c   :  { %v47_v10 = vmul.f32 %v2670_v9, %v2670_v9 }
  0x7d   :  { %v40_v11 = vpop.xlane.xlu0 %39 }
  0x7e   :  { %v42_v12 = vmul.f32 0.03125, %v40_v11  ;;  %49 = vadd.xlane.f32.xlu1 %v47_v10  ;;  %v184_v10 = vperm.slane %v2765_v8, 1 }
  0x80   :  { %v44_v13 = vsub.f32 %v36_v1, %v42_v12  ;;  %v82_v1 = vperm.slane %v34_v57, 1 }
  0x82   :  { %v2675_v14 = vmul.f32 %v2667_v7, %v44_v13 }
  0x84   :  { %v48_v15 = vmul.f32 %v2675_v14, %v2675_v14 }
  0x86   :  { %51 = vadd.xlane.f32.xlu1 %v48_v15 }
  0xf1   :  { %v50_v37 = vpop.xlane.xlu1 %49 }
  0xf2   :  { %v53_v40 = vmul.f32 0.03125, %v50_v37 }
  0xf4   :  { %v55_v42 = vadd.f32 1e-12, %v53_v40 }
  0xf6   :  { %2495 = vrsqrt.f32 %v55_v42  ;;  %vm63_vm2 = vweird.f32 %v55_v42 }
  0xf9   :  { %v52_v43 = vpop.xlane.xlu1 %51 }
  0xfa   :  { %v54_v44 = vmul.f32 0.03125, %v52_v43 }
  0xfc   :  { %v2496_v45 = vpop.eup %2495  ;;  %v56_v46 = vadd.f32 1e-12, %v54_v44 }
  0xfd   :  { %v58_v47 = vmul.f32 %v2496_v45, %v55_v42  ;;  %vm64_vm1 = vweird.f32 %v2496_v45 }
  0xfe   :  { %2497 = vrsqrt.f32 %v56_v46  ;;  %vm65_vm3 = vmor %vm63_vm2, %vm64_vm1  ;;  %vm73_vm5 = vweird.f32 %v56_v46 }
  0xff   :  { %v59_v48 = vmul.f32 %v2496_v45, %v58_v47 }
 0x101   :  { %v60_v49 = vmul.f32 0.5, %v59_v48 }
 0x103   :  { %v61_v50 = vsub.f32 1.5, %v60_v49  ;;  %v2056_v49 = vld [vmem:[%s3173_s2 + $0xc0] sm:$0xf] }
 0x104   :  { %v2498_v51 = vpop.eup %2497 }
 0x105   :  { %v62_v52 = vmul.f32 %v2496_v45, %v61_v50  ;;  %v68_v53 = vmul.f32 %v2498_v51, %v56_v46  ;;  %vm74_vm4 = vweird.f32 %v2498_v51  ;;  %v502_v50 = vsel %vm480_vm9, %v2056_v49, 0 }
 0x106   :  { %vm75_vm6 = vmor %vm73_vm5, %vm74_vm4 }
 0x107   :  { %v69_v54 = vmul.f32 %v2498_v51, %v68_v53  ;;  %v66_v55 = vsel %vm65_vm3, %v2496_v45, %v62_v52 }
 0x108   :  { %v77_v59 = vmul.f32 %v66_v55, %v2670_v9 }
 0x109   :  { %v70_v56 = vmul.f32 0.5, %v69_v54 }
 0x10a   :  { %v80_v0 = vmul.f32 %v79_v60, %v77_v59 }
 0x10b   :  { %v71_v58 = vsub.f32 1.5, %v70_v56 }
 0x10c   :  { %v2756_v3 = vadd.f32 %v82_v1, %v80_v0 }
 0x10d   :  { %v72_v61 = vmul.f32 %v2498_v51, %v71_v58 }
 0x10f   :  { %v76_v62 = vsel %vm75_vm6, %v2498_v51, %v72_v61 }
 0x110   :  { %v78_v63 = vmul.f32 %v76_v62, %v2675_v14 }
 0x112   :  { %v81_v2 = vmul.f32 %v79_v60, %v78_v63 }
 0x114   :  { %v2758_v4 = vadd.f32 %v82_v1, %v81_v2 }
 0x116   :  { %v87_v5 = vpack.c.bf16 %v2758_v4, %v2756_v3 }
 0x118   :  { %161 = vmatmul.bf16.vlgmr.msra.gmra.mxu0 %v87_v5  ;;  %241 = vmatmul.bf16.vlgmr.msra.gmra.mxu1 %v87_v5 }
 0x119   :  { %321 = vmatmul.bf16.vlgmr.msra.gmra.mxu2 %v87_v5 }
 0x195   :  { %v242_v6 = vpop.f32.mrf.mxu1  ;;  %v162_v9 = vpop.f32.mrf.mxu0 }
 0x196   :  { %v243_v13 = vadd.f32 %v242_v6, %v184_v10  ;;  %v163_v24 = vadd.f32 %v162_v9, %v104_v18 }
 0x19c   :  { %v322_v11 = vpop.f32.mrf.mxu2 }
 0x19d   :  { %v244_v12 = vpop.f32.mrf.mxu1  ;;  %v164_v17 = vpop.f32.mrf.mxu0  ;;  %v323_v22 = vadd.f32 %v322_v11, %v264_v16 }
 0x19e   :  { %v245_v14 = vadd.f32 %v244_v12, %v184_v10  ;;  %v165_v20 = vadd.f32 %v164_v17, %v104_v18 }
 0x1a0   :  { %v333_v15 = vpack.c.bf16 %v245_v14, %v243_v13  ;;  %v332_v26 = vpack.c.bf16 %v165_v20, %v163_v24 }
 0x1a2   :  { %v340_v19 = vsel %vm335_vm7, %v333_v15, 0 }
 0x1a3   :  { %349 = vmatpush.bf16.xpose.msrb.mxu2 %v340_v19 }
 0x1a4   :  { %v324_v21 = vpop.f32.mrf.mxu2 }
 0x1a5   :  { %v325_v23 = vadd.f32 %v324_v21, %v264_v16 }
 0x1a7   :  { %v2771_v25 = vpack.c.bf16 %v325_v23, %v323_v22 }
 0x1a9   :  { %394 = vmatpush.bf16.msra.mxu3 %v2771_v25 }
 0x1aa   :  { %2060 = vmatmul.msk.bf16.vlgmr.msrb.gmra.mxu2 %vm335_vm7, %v332_v26 }
 0x1ab   :  { %511 = vmatpush.bf16.msra.mxu2 %v502_v50 }
 0x22d   :  { %v351_v27 = vpop.f32.mrf.mxu2 }
 0x22e   :  { %v356_v29 = vmul.f32 0.35355338, %v351_v27 }
 0x230   :  { %v358_v30 = vadd.f32 %v356_v29, %v2778_v28 }
 0x232   :  { %v361_v31 = vsel %vm360_vm8, %v358_v30, -inf }
 0x233   :  { %362 = vmax.xlane.f32.xlu2 %v361_v31 }
 0x235   :  { %v353_v32 = vpop.f32.mrf.mxu2 }
 0x236   :  { %v357_v34 = vmul.f32 0.35355338, %v353_v32 }
 0x238   :  { %v359_v35 = vadd.f32 %v357_v34, %v2785_v33 }
 0x23a   :  { %v364_v36 = vsel %vm360_vm8, %v359_v35, -inf }
 0x23b   :  { %365 = vmax.xlane.f32.xlu2 %v364_v36 }
 0x253   :  { %406 = vrot.lane.b32.xlu2 %v333_v15, %s2617_s12 }
 0x25b   :  { %520 = vrot.lane.b32.xlu2 %v333_v15, %s2618_s13 }
 0x263   :  { %518 = vrot.lane.b32.xlu2 %v332_v26, %s2618_s13 }
 0x2a6   :  { %v363_v37 = vpop.xlane.xlu2 %362 }
 0x2a7   :  { %v367_v38 = vsub.f32 %v358_v30, %v363_v37 }
 0x2a9   :  { %v369_v39 = vmul.f32 1.442695, %v367_v38 }
 0x2ab   :  { %2499 = vpow2.f32 %v369_v39 }
 0x2ae   :  { %v366_v40 = vpop.xlane.xlu2 %365 }
 0x2af   :  { %v368_v41 = vsub.f32 %v359_v35, %v366_v40 }
 0x2b1   :  { %v2500_v42 = vpop.eup %2499  ;;  %v371_v43 = vmul.f32 1.442695, %v368_v41 }
 0x2b2   :  { %v373_v44 = vsel %vm360_vm8, %v2500_v42, 0.0 }
 0x2b3   :  { %2501 = vpow2.f32 %v371_v43  ;;  %374 = vadd.xlane.f32.xlu0 %v373_v44 }
 0x2b6   :  { %v407_v45 = vpop.permute.xlu2 %406 }
 0x2b7   :  { %v412_v46 = vsel %vm335_vm7, %v407_v45, 0 }
 0x2b8   :  { %421 = vmatpush.bf16.xpose.msrb.mxu3 %v412_v46 }
 0x2b9   :  { %v2502_v47 = vpop.eup %2501 }
 0x2ba   :  { %v376_v48 = vsel %vm360_vm8, %v2502_v47, 0.0 }
 0x2bb   :  { %377 = vadd.xlane.f32.xlu1 %v376_v48 }
 0x2be   :  { %v521_v57 = vpop.permute.xlu2 %520 }
 0x2bf   :  { %v526_v59 = vsel %vm335_vm7, %v521_v57, 0 }
 0x2c6   :  { %v519_v63 = vpop.permute.xlu2 %518 }
 0x2c7   :  { %403 = vrot.lane.b32.xlu0 %v332_v26, %s2617_s12 }
 0x2cf   :  { %612 = vrot.lane.b32.xlu0 %v332_v26, %s2619_s14 }
 0x2d4   :  { %614 = vrot.lane.b32.xlu1 %v333_v15, %s2619_s14 }
 0x326   :  { %v375_v51 = vpop.xlane.xlu0 %374 }
 0x327   :  { %2503 = vrcp.f32 %v375_v51 }
 0x32d   :  { %v2504_v53 = vpop.eup %2503 }
 0x32e   :  { %v378_v52 = vpop.xlane.xlu1 %377  ;;  %v381_v55 = vmul.f32 %v2504_v53, %v2500_v42 }
 0x32f   :  { %2505 = vrcp.f32 %v378_v52 }
 0x335   :  { %v2506_v54 = vpop.eup %2505 }
 0x336   :  { %v382_v56 = vmul.f32 %v2506_v54, %v2502_v47 }
 0x338   :  { %v383_v58 = vpack.c.bf16 %v382_v56, %v381_v55 }
 0x339   :  { %v404_v62 = vpop.permute.xlu0 %403 }
 0x33a   :  { %2061 = vmatmul.msk.bf16.vlgmr.msra.gmra.mxu3 %vm360_vm8, %v383_v58 }
 0x33b   :  { %535 = vmatpush.bf16.xpose.msra.mxu3 %v526_v59 }
 0x341   :  { %v613_v13 = vpop.permute.xlu0 %612 }
 0x346   :  { %v615_v60 = vpop.permute.xlu1 %614 }
 0x347   :  { %v620_v61 = vsel %vm335_vm7, %v615_v60, 0 }
 0x348   :  { %629 = vmatpush.bf16.xpose.msrb.mxu2 %v620_v61 }
 0x34a   :  { %2062 = vmatmul.msk.bf16.vlgmr.msrb.gmra.mxu3 %vm335_vm7, %v404_v62 }
 0x35a   :  { %2066 = vmatmul.msk.bf16.vlgmr.msra.gmra.mxu3 %vm335_vm7, %v519_v63 }
 0x3bd   :  { %v396_v0 = vpop.f32.mrf.mxu3 }
 0x3c5   :  { %v398_v1 = vpop.f32.mrf.mxu3 }
 0x3c6   :  { %v401_v2 = vpack.c.bf16 %v398_v1, %v396_v0 }
 0x3c8   :  { %2065 = vmatmul.msk.bf16.vlgmr.msra.gmra.mxu2 %vm335_vm7, %v401_v2 }
 0x3cd   :  { %v423_v5 = vpop.f32.mrf.mxu3 }
 0x3ce   :  { %v428_v6 = vmul.f32 0.35355338, %v423_v5 }
 0x3d0   :  { %v430_v9 = vadd.f32 %v428_v6, %v2778_v28 }
 0x3d2   :  { %v432_v10 = vsel %vm360_vm8, %v430_v9, -inf }
 0x3d3   :  { %433 = vmax.xlane.f32.xlu1 %v432_v10 }
 0x3d5   :  { %v425_v11 = vpop.f32.mrf.mxu3 }
 0x3d6   :  { %v429_v12 = vmul.f32 0.35355338, %v425_v11 }
 0x3d8   :  { %2069 = vmatmul.msk.bf16.vlgmr.msrb.gmra.mxu2 %vm335_vm7, %v613_v13  ;;  %v431_v14 = vadd.f32 %v429_v12, %v2785_v33 }
 0x3da   :  { %v435_v15 = vsel %vm360_vm8, %v431_v14, -inf }
 0x3db   :  { %436 = vmax.xlane.f32.xlu0 %v435_v15  ;;  %v2057_v15 = vld [vmem:[%s3173_s2 + $0xc4] sm:$0xf] }
 0x3dd   :  { %v537_v16 = vpop.f32.mrf.mxu3 }
 0x3de   :  { %v542_v17 = vmul.f32 0.35355338, %v537_v16  ;;  %v482_v16 = vsel %vm480_vm9, %v2057_v15, 0  ;;  %v2439_v15 = vld [vmem:[%s3174_s3 + $0x28] sm:$0xff] }
 0x3e0   :  { %v544_v18 = vadd.f32 %v542_v17, %v2778_v28 }
 0x3e2   :  { %v546_v19 = vsel %vm360_vm8, %v544_v18, -inf }
 0x3e3   :  { %547 = vmax.xlane.f32.xlu0 %v546_v19 }
 0x3e5   :  { %v539_v32 = vpop.f32.mrf.mxu3 }
 0x3e6   :  { %v543_v36 = vmul.f32 0.35355338, %v539_v32 }
 0x3e8   :  { %v545_v42 = vadd.f32 %v543_v36, %v2785_v33 }
 0x3ea   :  { %v549_v46 = vsel %vm360_vm8, %v545_v42, -inf }
 0x446   :  { %v434_v30 = vpop.xlane.xlu1 %433 }
 0x447   :  { %v438_v35 = vsub.f32 %v430_v9, %v434_v30 }
 0x449   :  { %v440_v38 = vmul.f32 1.442695, %v438_v35 }
 0x44b   :  { %v2815_v20 = vpop.f32.mrf.mxu2 }
 0x44e   :  { %v437_v21 = vpop.xlane.xlu0 %436 }
 0x44f   :  { %v439_v22 = vsub.f32 %v431_v14, %v437_v21 }
 0x451   :  { %v442_v23 = vmul.f32 1.442695, %v439_v22 }
 0x453   :  { %2507 = vpow2.f32 %v442_v23  ;;  %v2817_v24 = vpop.f32.mrf.mxu2 }
 0x454   :  { %2509 = vpow2.f32 %v440_v38 }
 0x456   :  { %v548_v40 = vpop.xlane.xlu0 %547 }
 0x457   :  { %v552_v44 = vsub.f32 %v544_v18, %v548_v40  ;;  %v2059_v40 = vld [vmem:[%s3173_s2 + $0xcc] sm:$0xf] }
 0x459   :  { %v2508_v26 = vpop.eup %2507  ;;  %v554_v47 = vmul.f32 1.442695, %v552_v44 }
 0x45a   :  { %v447_v27 = vsel %vm360_vm8, %v2508_v26, 0.0  ;;  %v2510_v48 = vpop.eup %2509 }
 0x45b   :  { %v631_v29 = vpop.f32.mrf.mxu2  ;;  %448 = vadd.xlane.f32.xlu0 %v447_v27  ;;  %2511 = vpow2.f32 %v554_v47  ;;  %v444_v49 = vsel %vm360_vm8, %v2510_v48, 0.0 }
 0x45c   :  { %v636_v31 = vmul.f32 0.35355338, %v631_v29 }
 0x45e   :  { %v638_v34 = vadd.f32 %v636_v31, %v2778_v28 }
 0x460   :  { %v640_v37 = vsel %vm360_vm8, %v638_v34, -inf }
 0x461   :  { %641 = vmax.xlane.f32.xlu2 %v640_v37  ;;  %v2827_v50 = vpop.eup %2511 }
 0x462   :  { %v558_v51 = vsel %vm360_vm8, %v2827_v50, 0.0 }
 0x463   :  { %v633_v39 = vpop.f32.mrf.mxu2 }
 0x464   :  { %v637_v41 = vmul.f32 0.35355338, %v633_v39 }
 0x466   :  { %v639_v43 = vadd.f32 %v637_v41, %v2785_v33  ;;  %v688_v41 = vsel %vm480_vm9, %v2059_v40, 0 }
 0x468   :  { %v643_v45 = vsel %vm360_vm8, %v639_v43, -inf }
 0x469   :  { %644 = vmax.xlane.f32.xlu1 %v643_v45  ;;  %550 = vmax.xlane.f32.xlu2 %v549_v46 }
 0x471   :  { %445 = vadd.xlane.f32.xlu1 %v444_v49 }
 0x479   :  { %559 = vadd.xlane.f32.xlu1 %v558_v51 }
 0x481   :  { %456 = vrot.lane.b32.xlu2 %v2771_v25, %s2617_s12 }
 0x4ce   :  { %v449_v60 = vpop.xlane.xlu0 %448 }
 0x4d4   :  { %v642_v52 = vpop.xlane.xlu2 %641 }
 0x4d5   :  { %v646_v53 = vsub.f32 %v638_v34, %v642_v52 }
 0x4d7   :  { %v648_v54 = vmul.f32 1.442695, %v646_v53 }
 0x4d9   :  { %2513 = vpow2.f32 %v648_v54 }
 0x4dc   :  { %v645_v55 = vpop.xlane.xlu1 %644  ;;  %v551_v56 = vpop.xlane.xlu2 %550 }
 0x4dd   :  { %v553_v57 = vsub.f32 %v545_v42, %v551_v56  ;;  %v647_v61 = vsub.f32 %v639_v43, %v645_v55  ;;  %v2058_v42 = vld [vmem:[%s3173_s2 + $0xc8] sm:$0xf]  ;;  %v706_v56 = vperm.slane %v2765_v8, 3 }
 0x4de   :  { %v594_v43 = vsel %vm480_vm9, %v2058_v42, 0 }
 0x4df   :  { %v2514_v58 = vpop.eup %2513  ;;  %v556_v59 = vmul.f32 1.442695, %v553_v57  ;;  %v650_v63 = vmul.f32 1.442695, %v647_v61 }
 0x4e0   :  { %v652_v62 = vsel %vm360_vm8, %v2514_v58, 0.0 }
 0x4e1   :  { %653 = vadd.xlane.f32.xlu1 %v652_v62  ;;  %2515 = vpow2.f32 %v556_v59 }
 0x4e2   :  { %2517 = vrcp.f32 %v449_v60 }
 0x4e4   :  { %v446_v0 = vpop.xlane.xlu1 %445  ;;  %v457_v1 = vpop.permute.xlu2 %456 }
 0x4e5   :  { %2519 = vrcp.f32 %v446_v0  ;;  %469 = vmatpush.bf16.msrb.mxu1 %v457_v1 }
 0x4e6   :  { %2521 = vpow2.f32 %v650_v63 }
 0x4e7   :  { %v2516_v2 = vpop.eup %2515 }
 0x4e8   :  { %v2518_v5 = vpop.eup %2517  ;;  %v561_v6 = vsel %vm360_vm8, %v2516_v2, 0.0 }
 0x4e9   :  { %562 = vadd.xlane.f32.xlu0 %v561_v6  ;;  %v453_v10 = vmul.f32 %v2518_v5, %v2508_v26  ;;  %491 = vmatpush.bf16.msra.mxu1 %v482_v16  ;;  %v2438_v16 = vld [vmem:[%s3174_s3 + $0x20] sm:$0xff] }
 0x4eb   :  { %v2520_v9 = vpop.eup %2519 }
 0x4ec   :  { %v452_v11 = vmul.f32 %v2520_v9, %v2510_v48  ;;  %v2522_v12 = vpop.eup %2521  ;;  %v560_v17 = vpop.xlane.xlu1 %559 }
 0x4ed   :  { %v655_v14 = vsel %vm360_vm8, %v2522_v12, 0.0 }
 0x4ee   :  { %v454_v13 = vpack.c.bf16 %v453_v10, %v452_v11 }
 0x4f0   :  { %2063 = vmatmul.msk.bf16.vlgmr.msrb.gmra.mxu1 %vm360_vm8, %v454_v13 }
 0x4f1   :  { %656 = vadd.xlane.f32.xlu0 %v655_v14  ;;  %603 = vmatpush.bf16.msrb.mxu1 %v594_v43  ;;  %v2441_v14 = vld [vmem:[%s3174_s3 + $0x38] sm:$0xff] }
 0x4fa   :  { %663 = vrot.lane.b32.xlu1 %v2771_v25, %s2619_s14 }
 0x505   :  { %569 = vrot.lane.b32.xlu0 %v2771_v25, %s2618_s13 }
 0x554   :  { %v654_v19 = vpop.xlane.xlu1 %653 }
 0x555   :  { %2523 = vrcp.f32 %v654_v19  ;;  %v2435_v19 = vld [vmem:[%s3174_s3 + $0x8] sm:$0xff] }
 0x55b   :  { %v2524_v22 = vpop.eup %2523 }
 0x55c   :  { %v563_v18 = vpop.xlane.xlu0 %562  ;;  %v660_v27 = vmul.f32 %v2524_v22, %v2514_v58  ;;  %v2434_v22 = vld [vmem:[%s3174_s3] sm:$0xff] }
 0x564   :  { %v657_v21 = vpop.xlane.xlu0 %656 }
 0x565   :  { %2525 = vrcp.f32 %v657_v21 }
 0x566   :  { %2527 = vrcp.f32 %v563_v18  ;;  %v2436_v18 = vld [vmem:[%s3174_s3 + $0x10] sm:$0xff] }
 0x567   :  { %2529 = vrcp.f32 %v560_v17  ;;  %v2437_v17 = vld [vmem:[%s3174_s3 + $0x18] sm:$0xff] }
 0x56b   :  { %v2526_v23 = vpop.eup %2525 }
 0x56c   :  { %v664_v26 = vpop.permute.xlu1 %663  ;;  %v661_v29 = vmul.f32 %v2526_v23, %v2522_v12  ;;  %v2528_v31 = vpop.eup %2527 }
 0x56d   :  { %v471_v25 = vpop.f32.mrf.mxu1  ;;  %676 = vmatpush.bf16.msrb.mxu3 %v664_v26  ;;  %v2530_v32 = vpop.eup %2529  ;;  %v567_v35 = vmul.f32 %v2528_v31, %v2516_v2 }
 0x56e   :  { %v662_v30 = vpack.c.bf16 %v661_v29, %v660_v27  ;;  %v566_v37 = vmul.f32 %v2530_v32, %v2827_v50 }
 0x570   :  { %2070 = vmatmul.msk.bf16.vlgmr.msrb.gmra.mxu3 %vm360_vm8, %v662_v30  ;;  %v568_v39 = vpack.c.bf16 %v567_v35, %v566_v37 }
 0x575   :  { %v473_v34 = vpop.f32.mrf.mxu1 }
 0x576   :  { %v476_v36 = vpack.c.bf16 %v473_v34, %v471_v25 }
 0x577   :  { %v570_v38 = vpop.permute.xlu0 %569 }
 0x578   :  { %2064 = vmatmul.msk.bf16.vlgmr.msra.gmra.mxu1 %vm335_vm7, %v476_v36  ;;  %582 = vmatpush.bf16.msrb.mxu0 %v570_v38 }
 0x579   :  { %825 = vmatpush.bf16.msra.mxu1 %v2441_v14 }
 0x57b   :  { %2067 = vmatmul.msk.bf16.vlgmr.msrb.gmra.mxu0 %vm360_vm8, %v568_v39 }
 0x57c   :  { %697 = vmatpush.bf16.msra.mxu0 %v688_v41 }
 0x5f3   :  { %v678_v44 = vpop.f32.mrf.mxu3 }
 0x5f5   :  { %v493_v50 = vpop.f32.mrf.mxu1 }
 0x5f6   :  { %v514_v52 = vadd.f32 %v2815_v20, %v493_v50 }
 0x5f8   :  { %v584_v45 = vpop.f32.mrf.mxu0 }
 0x5fb   :  { %v680_v46 = vpop.f32.mrf.mxu3 }
 0x5fc   :  { %v683_v47 = vpack.c.bf16 %v680_v46, %v678_v44  ;;  %v753_v44 = vperm.slane %v2765_v8, 4 }
 0x5fd   :  { %v495_v51 = vpop.f32.mrf.mxu1 }
 0x5fe   :  { %2071 = vmatmul.msk.bf16.vlgmr.msra.gmra.mxu0 %vm335_vm7, %v683_v47  ;;  %v516_v59 = vadd.f32 %v2817_v24, %v495_v51 }
 0x600   :  { %v586_v48 = vpop.f32.mrf.mxu0 }
 0x601   :  { %v589_v49 = vpack.c.bf16 %v586_v48, %v584_v45 }
 0x603   :  { %2068 = vmatmul.msk.bf16.vlgmr.msrb.gmra.mxu1 %vm335_vm7, %v589_v49  ;;  %v756_v49 = vperm.slane %v2765_v8, 5 }
 0x67b   :  { %v699_v53 = vpop.f32.mrf.mxu0 }
 0x680   :  { %v605_v54 = vpop.f32.mrf.mxu1 }
 0x681   :  { %v610_v55 = vadd.f32 %v605_v54, %v514_v52  ;;  %v2449_v54 = vld [vmem:[%s3174_s3 + $0x78] sm:$0xff] }
 0x682   :  { %924 = vmatpush.bf16.msra.mxu2 %v2449_v54  ;;  %v2453_v54 = vld [vmem:[%s3173_s2 + $0x118] sm:$0xff] }
 0x683   :  { %v704_v57 = vadd.f32 %v699_v53, %v610_v55  ;;  %v701_v63 = vpop.f32.mrf.mxu0  ;;  %v2448_v55 = vld [vmem:[%s3174_s3 + $0x70] sm:$0xff] }
 0x685   :  { %v707_v58 = vadd.f32 %v706_v56, %v704_v57  ;;  %v2446_v57 = vld [vmem:[%s3174_s3 + $0x60] sm:$0xff] }
 0x686   :  { %925 = vmatpush.bf16.msra.mxu2 %v2448_v55  ;;  %v2461_v55 = vld [vmem:[%s3173_s2 + $0x158] sm:$0xff] }
 0x687   :  { %v709_v60 = vadd.f32 %v707_v58, %v2756_v3  ;;  %v2445_v58 = vld [vmem:[%s3174_s3 + $0x58] sm:$0xff] }
 0x688   :  { %v607_v61 = vpop.f32.mrf.mxu1 }
 0x689   :  { %v611_v62 = vadd.f32 %v607_v61, %v516_v59  ;;  %711 = vadd.xlane.f32.xlu2 %v709_v60  ;;  %v2444_v59 = vld [vmem:[%s3174_s3 + $0x50] sm:$0xff]  ;;  %v2442_v61 = vld [vmem:[%s3174_s3 + $0x40] sm:$0xff] }
 0x68b   :  { %v705_v0 = vadd.f32 %v701_v63, %v611_v62  ;;  %v776_v62 = vperm.slane %v2765_v8, 6 }
 0x68d   :  { %v708_v1 = vadd.f32 %v706_v56, %v705_v0  ;;  %v2447_v56 = vld [vmem:[%s3174_s3 + $0x68] sm:$0xff] }
 0x68e   :  { %926 = vmatpush.bf16.msra.mxu2 %v2447_v56  ;;  %v2469_v56 = vld [vmem:[%s3173_s2 + $0x198] sm:$0xff] }
 0x68f   :  { %v710_v2 = vadd.f32 %v708_v1, %v2758_v4  ;;  %v2440_v4 = vld [vmem:[%s3174_s3 + $0x30] sm:$0xff] }
 0x690   :  { %826 = vmatpush.bf16.msra.mxu1 %v2440_v4 }
 0x691   :  { %713 = vadd.xlane.f32.xlu0 %v710_v2 }
 0x692   :  { %927 = vmatpush.bf16.msra.mxu2 %v2446_v57  ;;  %v2452_v57 = vld [vmem:[%s3173_s2 + $0x110] sm:$0xff] }
 0x694   :  { %827 = vmatpush.bf16.msra.mxu1 %v2439_v15 }
 0x696   :  { %928 = vmatpush.bf16.msra.mxu2 %v2445_v58  ;;  %v2460_v58 = vld [vmem:[%s3173_s2 + $0x150] sm:$0xff] }
 0x698   :  { %828 = vmatpush.bf16.msra.mxu1 %v2438_v16 }
 0x69a   :  { %929 = vmatpush.bf16.msra.mxu2 %v2444_v59  ;;  %v2468_v59 = vld [vmem:[%s3173_s2 + $0x190] sm:$0xff] }
 0x69c   :  { %829 = vmatpush.bf16.msra.mxu1 %v2437_v17 }
 0x6a0   :  { %830 = vmatpush.bf16.msra.mxu1 %v2436_v18 }
 0x6a4   :  { %831 = vmatpush.bf16.msra.mxu1 %v2435_v19 }
 0x6a8   :  { %832 = vmatpush.bf16.msra.mxu1 %v2434_v22 }
 0x6fc   :  { %v712_v20 = vpop.xlane.xlu2 %711 }
 0x6fd   :  { %v715_v5 = vmul.f32 0.03125, %v712_v20 }
 0x6ff   :  { %v717_v6 = vsub.f32 %v709_v60, %v715_v5  ;;  %v2443_v60 = vld [vmem:[%s3174_s3 + $0x48] sm:$0xff] }
 0x700   :  { %930 = vmatpush.bf16.msra.mxu2 %v2443_v60  ;;  %v2451_v60 = vld [vmem:[%s3173_s2 + $0x108] sm:$0xff] }
 0x701   :  { %v719_v9 = vmul.f32 %v2667_v7, %v717_v6 }
 0x703   :  { %v721_v10 = vmul.f32 %v719_v9, %v719_v9 }
 0x704   :  { %v714_v11 = vpop.xlane.xlu0 %713  ;;  %931 = vmatpush.bf16.msra.mxu2 %v2442_v61  ;;  %v2459_v61 = vld [vmem:[%s3173_s2 + $0x148] sm:$0xff] }
 0x705   :  { %v716_v12 = vmul.f32 0.03125, %v714_v11  ;;  %723 = vadd.xlane.f32.xlu1 %v721_v10 }
 0x707   :  { %v718_v24 = vsub.f32 %v710_v2, %v716_v12 }
 0x709   :  { %v720_v3 = vmul.f32 %v2667_v7, %v718_v24 }
 0x70b   :  { %v722_v13 = vmul.f32 %v720_v3, %v720_v3 }
 0x70d   :  { %725 = vadd.xlane.f32.xlu2 %v722_v13 }
 0x778   :  { %v724_v21 = vpop.xlane.xlu1 %723 }
 0x779   :  { %v727_v23 = vmul.f32 0.03125, %v724_v21 }
 0x77b   :  { %v729_v26 = vadd.f32 1e-12, %v727_v23  ;;  %v875_v23 = vperm.slane %v2765_v8, 7 }
 0x77d   :  { %2531 = vrsqrt.f32 %v729_v26  ;;  %vm737_vm11 = vweird.f32 %v729_v26 }
 0x780   :  { %v726_v27 = vpop.xlane.xlu2 %725 }
 0x781   :  { %v728_v29 = vmul.f32 0.03125, %v726_v27 }
 0x783   :  { %v2532_v25 = vpop.eup %2531  ;;  %v730_v30 = vadd.f32 1e-12, %v728_v29 }
 0x784   :  { %v732_v31 = vmul.f32 %v2532_v25, %v729_v26  ;;  %vm738_vm10 = vweird.f32 %v2532_v25 }
 0x785   :  { %2533 = vrsqrt.f32 %v730_v30  ;;  %vm739_vm12 = vmor %vm737_vm11, %vm738_vm10  ;;  %vm747_vm14 = vweird.f32 %v730_v30 }
 0x786   :  { %v733_v32 = vmul.f32 %v2532_v25, %v732_v31 }
 0x788   :  { %v734_v34 = vmul.f32 0.5, %v733_v32 }
 0x78a   :  { %v735_v35 = vsub.f32 1.5, %v734_v34 }
 0x78b   :  { %v2534_v36 = vpop.eup %2533 }
 0x78c   :  { %v736_v37 = vmul.f32 %v2532_v25, %v735_v35  ;;  %v742_v38 = vmul.f32 %v2534_v36, %v730_v30  ;;  %vm748_vm13 = vweird.f32 %v2534_v36 }
 0x78d   :  { %vm749_vm15 = vmor %vm747_vm14, %vm748_vm13 }
 0x78e   :  { %v743_v39 = vmul.f32 %v2534_v36, %v742_v38  ;;  %v740_v40 = vsel %vm739_vm12, %v2532_v25, %v736_v37 }
 0x78f   :  { %v751_v43 = vmul.f32 %v740_v40, %v719_v9 }
 0x790   :  { %v744_v41 = vmul.f32 0.5, %v743_v39 }
 0x791   :  { %v754_v48 = vmul.f32 %v753_v44, %v751_v43  ;;  %v2465_v43 = vld [vmem:[%s3173_s2 + $0x178] sm:$0xff] }
 0x792   :  { %v745_v42 = vsub.f32 1.5, %v744_v41  ;;  %1138 = vmatpush.bf16.msrb.mxu0 %v2465_v43 }
 0x793   :  { %v757_v51 = vadd.f32 %v756_v49, %v754_v48  ;;  %v2455_v48 = vld [vmem:[%s3173_s2 + $0x128] sm:$0xff] }
 0x794   :  { %v746_v45 = vmul.f32 %v2534_v36, %v745_v42  ;;  %v2457_v42 = vld [vmem:[%s3173_s2 + $0x138] sm:$0xff] }
 0x795   :  { %1058 = vmatpush.bf16.msra.mxu3 %v2457_v42 }
 0x796   :  { %v750_v46 = vsel %vm749_vm15, %v2534_v36, %v746_v45  ;;  %v2456_v45 = vld [vmem:[%s3173_s2 + $0x130] sm:$0xff] }
 0x797   :  { %v752_v47 = vmul.f32 %v750_v46, %v720_v3  ;;  %v2464_v46 = vld [vmem:[%s3173_s2 + $0x170] sm:$0xff] }
 0x798   :  { %1139 = vmatpush.bf16.msrb.mxu0 %v2464_v46 }
 0x799   :  { %v755_v50 = vmul.f32 %v753_v44, %v752_v47  ;;  %v2473_v44 = vld [vmem:[%s3173_s2 + $0x1b8] sm:$0xff]  ;;  %v2472_v47 = vld [vmem:[%s3173_s2 + $0x1b0] sm:$0xff]  ;;  %1059 = vmatpush.bf16.msra.mxu3 %v2456_v45 }
 0x79a   :  { %1218 = vmatpush.bf16.msrb.mxu1 %v2473_v44 }
 0x79b   :  { %v758_v52 = vadd.f32 %v756_v49, %v755_v50  ;;  %v2463_v49 = vld [vmem:[%s3173_s2 + $0x168] sm:$0xff] }
 0x79c   :  { %v2471_v50 = vld [vmem:[%s3173_s2 + $0x1a8] sm:$0xff]  ;;  %1140 = vmatpush.bf16.msrb.mxu0 %v2463_v49 }
 0x79d   :  { %v759_v53 = vpack.c.bf16 %v758_v52, %v757_v51  ;;  %1060 = vmatpush.bf16.msra.mxu3 %v2455_v48 }
 0x79e   :  { %1219 = vmatpush.bf16.msrb.mxu1 %v2472_v47 }
 0x79f   :  { %833 = vmatmul.bf16.vlgmr.msra.gmra.mxu1 %v759_v53  ;;  %v2470_v53 = vld [vmem:[%s3173_s2 + $0x1a0] sm:$0xff] }
 0x7a2   :  { %1220 = vmatpush.bf16.msrb.mxu1 %v2471_v50 }
 0x7a6   :  { %1221 = vmatpush.bf16.msrb.mxu1 %v2470_v53 }
 0x7aa   :  { %1222 = vmatpush.bf16.msrb.mxu1 %v2469_v56 }
 0x7ae   :  { %1223 = vmatpush.bf16.msrb.mxu1 %v2468_v59 }
 0x81c   :  { %v834_v63 = vpop.f32.mrf.mxu1 }
 0x81d   :  { %v835_v0 = vadd.f32 %v834_v63, %v776_v62 }
 0x81f   :  { %v841_v1 = vmul.f32 0.044715, %v835_v0  ;;  %v839_v16 = vmul.f32 0.5, %v835_v0 }
 0x821   :  { %v843_v2 = vmul.f32 %v841_v1, %v835_v0  ;;  %v2458_v1 = vld [vmem:[%s3173_s2 + $0x140] sm:$0xff] }
 0x823   :  { %v845_v20 = vmul.f32 %v843_v2, %v835_v0 }
 0x824   :  { %v836_v5 = vpop.f32.mrf.mxu1 }
 0x825   :  { %v847_v6 = vadd.f32 %v845_v20, %v835_v0  ;;  %v837_v9 = vadd.f32 %v836_v5, %v776_v62  ;;  %v2467_v62 = vld [vmem:[%s3173_s2 + $0x188] sm:$0xff]  ;;  %v2450_v0 = vld [vmem:[%s3173_s2 + $0x100] sm:$0xff] }
 0x826   :  { %1224 = vmatpush.bf16.msrb.mxu1 %v2467_v62  ;;  %v2466_v20 = vld [vmem:[%s3173_s2 + $0x180] sm:$0xff] }
 0x827   :  { %v842_v10 = vmul.f32 0.044715, %v837_v9  ;;  %v849_v11 = vmul.f32 0.7978846, %v847_v6  ;;  %v840_v17 = vmul.f32 0.5, %v837_v9 }
 0x829   :  { %v844_v12 = vmul.f32 %v842_v10, %v837_v9  ;;  %2535 = vtanh.f32 %v849_v11 }
 0x82a   :  { %1225 = vmatpush.bf16.msrb.mxu1 %v2466_v20 }
 0x82b   :  { %v846_v24 = vmul.f32 %v844_v12, %v837_v9 }
 0x82d   :  { %v848_v3 = vadd.f32 %v846_v24, %v837_v9 }
 0x82f   :  { %v850_v13 = vmul.f32 0.7978846, %v848_v3  ;;  %v2536_v14 = vpop.eup %2535 }
 0x830   :  { %v853_v4 = vadd.f32 1.0, %v2536_v14 }
 0x831   :  { %2537 = vtanh.f32 %v850_v13 }
 0x832   :  { %v855_v19 = vmul.f32 %v853_v4, %v839_v16 }
 0x837   :  { %v2538_v15 = vpop.eup %2537 }
 0x838   :  { %v854_v18 = vadd.f32 1.0, %v2538_v15 }
 0x83a   :  { %v856_v21 = vmul.f32 %v854_v18, %v840_v17 }
 0x83c   :  { %v857_v22 = vpack.c.bf16 %v856_v21, %v855_v19  ;;  %v86_v19 = vld [vmem:[%s3175_s4 + $0x8] sm:$0x3] }
 0x83e   :  { %932 = vmatmul.bf16.vlgmr.msra.gmra.mxu2 %v857_v22 }
 0x8c1   :  { %v933_v26 = vpop.f32.mrf.mxu2 }
 0x8c2   :  { %v934_v27 = vadd.f32 %v933_v26, %v875_v23 }
 0x8c4   :  { %v938_v29 = vadd.f32 %v934_v27, %v757_v51  ;;  %v2454_v51 = vld [vmem:[%s3173_s2 + $0x120] sm:$0xff] }
 0x8c5   :  { %1061 = vmatpush.bf16.msra.mxu3 %v2454_v51 }
 0x8c6   :  { %940 = vadd.xlane.f32.xlu2 %v938_v29 }
 0x8c9   :  { %v935_v25 = vpop.f32.mrf.mxu2  ;;  %1062 = vmatpush.bf16.msra.mxu3 %v2453_v54 }
 0x8ca   :  { %v936_v30 = vadd.f32 %v935_v25, %v875_v23  ;;  %v982_v23 = vperm.slane %v86_v19, 0 }
 0x8cc   :  { %v939_v31 = vadd.f32 %v936_v30, %v758_v52  ;;  %v2462_v52 = vld [vmem:[%s3173_s2 + $0x160] sm:$0xff]  ;;  %v985_v30 = vperm.slane %v86_v19, 1 }
 0x8cd   :  { %1141 = vmatpush.bf16.msrb.mxu0 %v2462_v52  ;;  %1063 = vmatpush.bf16.msra.mxu3 %v2452_v57 }
 0x8ce   :  { %942 = vadd.xlane.f32.xlu2 %v939_v31 }
 0x8d1   :  { %1142 = vmatpush.bf16.msrb.mxu0 %v2461_v55  ;;  %1064 = vmatpush.bf16.msra.mxu3 %v2451_v60 }
 0x8d5   :  { %1143 = vmatpush.bf16.msrb.mxu0 %v2460_v58  ;;  %1065 = vmatpush.bf16.msra.mxu3 %v2450_v0 }
 0x8d9   :  { %1144 = vmatpush.bf16.msrb.mxu0 %v2459_v61 }
 0x8dd   :  { %1145 = vmatpush.bf16.msrb.mxu0 %v2458_v1 }
 0x939   :  { %v941_v32 = vpop.xlane.xlu2 %940 }
 0x93a   :  { %v944_v34 = vmul.f32 0.03125, %v941_v32 }
 0x93c   :  { %v946_v35 = vsub.f32 %v938_v29, %v944_v34 }
 0x93e   :  { %v2919_v36 = vmul.f32 %v2667_v7, %v946_v35 }
 0x940   :  { %v950_v37 = vmul.f32 %v2919_v36, %v2919_v36 }
 0x941   :  { %v943_v38 = vpop.xlane.xlu2 %942 }
 0x942   :  { %v945_v39 = vmul.f32 0.03125, %v943_v38  ;;  %952 = vadd.xlane.f32.xlu0 %v950_v37  ;;  %v3014_v38 = vld [vmem:[%s3175_s4 + $0x10] sm:$0xff] }
 0x943   :  { %v1009_v49 = vperm.slane %v3014_v38, 0 }
 0x944   :  { %v947_v8 = vsub.f32 %v939_v31, %v945_v39  ;;  %v1089_v39 = vperm.slane %v3014_v38, 1 }
 0x946   :  { %v2924_v40 = vmul.f32 %v2667_v7, %v947_v8  ;;  %v1169_v8 = vperm.slane %v3014_v38, 2 }
 0x948   :  { %v951_v41 = vmul.f32 %v2924_v40, %v2924_v40 }
 0x94a   :  { %954 = vadd.xlane.f32.xlu1 %v951_v41 }
 0x9b5   :  { %v953_v63 = vpop.xlane.xlu0 %952 }
 0x9b6   :  { %v956_v2 = vmul.f32 0.03125, %v953_v63 }
 0x9b8   :  { %v958_v5 = vadd.f32 1e-12, %v956_v2 }
 0x9ba   :  { %2539 = vrsqrt.f32 %v958_v5  ;;  %vm966_vm1 = vweird.f32 %v958_v5 }
 0x9bd   :  { %v955_v6 = vpop.xlane.xlu1 %954 }
 0x9be   :  { %v957_v9 = vmul.f32 0.03125, %v955_v6 }
 0x9c0   :  { %v2540_v10 = vpop.eup %2539  ;;  %v959_v11 = vadd.f32 1e-12, %v957_v9 }
 0x9c1   :  { %v961_v12 = vmul.f32 %v2540_v10, %v958_v5  ;;  %vm967_vm0 = vweird.f32 %v2540_v10 }
 0x9c2   :  { %2541 = vrsqrt.f32 %v959_v11  ;;  %vm968_vm2 = vmor %vm966_vm1, %vm967_vm0  ;;  %vm976_vm4 = vweird.f32 %v959_v11 }
 0x9c3   :  { %v962_v24 = vmul.f32 %v2540_v10, %v961_v12  ;;  %v2298_v12 = vld [vmem:[%s3173_s2 + $0x1c0] sm:$0xf] }
 0x9c5   :  { %v963_v3 = vmul.f32 0.5, %v962_v24  ;;  %v1404_v24 = vsel %vm480_vm9, %v2298_v12, 0 }
 0x9c7   :  { %v964_v13 = vsub.f32 1.5, %v963_v3 }
 0x9c8   :  { %v2542_v14 = vpop.eup %2541 }
 0x9c9   :  { %v965_v4 = vmul.f32 %v2540_v10, %v964_v13  ;;  %v971_v15 = vmul.f32 %v2542_v14, %v959_v11  ;;  %vm977_vm3 = vweird.f32 %v2542_v14 }
 0x9ca   :  { %vm978_vm5 = vmor %vm976_vm4, %vm977_vm3  ;;  %vm1899_vm3 = vcmask 1041408   ;;  %vm1905_vm4 = vcmask 1024  }
 0x9cb   :  { %v972_v16 = vmul.f32 %v2542_v14, %v971_v15  ;;  %v969_v17 = vsel %vm968_vm2, %v2540_v10, %v965_v4  ;;  %vm1894_vm2 = vcmask 1040384  }
 0x9cc   :  { %v980_v22 = vmul.f32 %v969_v17, %v2919_v36 }
 0x9cd   :  { %v973_v18 = vmul.f32 0.5, %v972_v16 }
 0x9ce   :  { %v983_v25 = vmul.f32 %v982_v23, %v980_v22 }
 0x9cf   :  { %v974_v21 = vsub.f32 1.5, %v973_v18 }
 0x9d0   :  { %v3005_v32 = vadd.f32 %v985_v30, %v983_v25 }
 0x9d1   :  { %v975_v26 = vmul.f32 %v2542_v14, %v974_v21 }
 0x9d3   :  { %v979_v27 = vsel %vm978_vm5, %v2542_v14, %v975_v26 }
 0x9d4   :  { %v981_v29 = vmul.f32 %v979_v27, %v2924_v40 }
 0x9d6   :  { %v984_v31 = vmul.f32 %v982_v23, %v981_v29 }
 0x9d8   :  { %v3007_v34 = vadd.f32 %v985_v30, %v984_v31 }
 0x9da   :  { %v991_v35 = vpack.c.bf16 %v3007_v34, %v3005_v32 }
 0x9dc   :  { %1066 = vmatmul.bf16.vlgmr.msra.gmra.mxu3 %v991_v35  ;;  %1146 = vmatmul.bf16.vlgmr.msrb.gmra.mxu0 %v991_v35 }
 0x9dd   :  { %1226 = vmatmul.bf16.vlgmr.msrb.gmra.mxu1 %v991_v35  ;;  %v2587_v35 = vld [vmem:[%s3172_s1] sm:$0xff] }
 0xa59   :  { %v1147_v36 = vpop.f32.mrf.mxu0 }
 0xa5a   :  { %v1227_v37 = vpop.f32.mrf.mxu1  ;;  %v1148_v42 = vadd.f32 %v1147_v36, %v1089_v39 }
 0xa5b   :  { %v1228_v45 = vadd.f32 %v1227_v37, %v1169_v8 }
 0xa5f   :  { %v1067_v40 = vpop.f32.mrf.mxu3 }
 0xa60   :  { %v1068_v53 = vadd.f32 %v1067_v40, %v1009_v49 }
 0xa61   :  { %v1149_v41 = vpop.f32.mrf.mxu0 }
 0xa62   :  { %v1150_v43 = vadd.f32 %v1149_v41, %v1089_v39  ;;  %v1229_v44 = vpop.f32.mrf.mxu1 }
 0xa63   :  { %v1230_v46 = vadd.f32 %v1229_v44, %v1169_v8 }
 0xa64   :  { %v1238_v47 = vpack.c.bf16 %v1150_v43, %v1148_v42 }
 0xa65   :  { %v3018_v48 = vpack.c.bf16 %v1230_v46, %v1228_v45  ;;  %v2588_v46 = vld [vmem:[%s3172_s1 + $0x8] sm:$0xff] }
 0xa66   :  { %v1244_v50 = vsel %vm335_vm7, %v1238_v47, 0 }
 0xa67   :  { %1297 = vmatpush.bf16.msrb.mxu3 %v3018_v48  ;;  %v1069_v51 = vpop.f32.mrf.mxu3  ;;  %1253 = vmatpush.bf16.xpose.msrb.mxu2 %v1244_v50 }
 0xa68   :  { %v1070_v52 = vadd.f32 %v1069_v51, %v1009_v49 }
 0xa6a   :  { %v1237_v54 = vpack.c.bf16 %v1070_v52, %v1068_v53 }
 0xa6e   :  { %2302 = vmatmul.msk.bf16.vlgmr.msrb.gmra.mxu2 %vm335_vm7, %v1237_v54 }
 0xaf1   :  { %v1255_v55 = vpop.f32.mrf.mxu2 }
 0xaf2   :  { %v1260_v56 = vmul.f32 0.35355338, %v1255_v55 }
 0xaf4   :  { %v1262_v57 = vadd.f32 %v1260_v56, %v2778_v28 }
 0xaf6   :  { %v1264_v58 = vsel %vm360_vm8, %v1262_v57, -inf }
 0xaf7   :  { %1265 = vmax.xlane.f32.xlu2 %v1264_v58 }
 0xaf9   :  { %v1257_v59 = vpop.f32.mrf.mxu2 }
 0xafa   :  { %v1261_v60 = vmul.f32 0.35355338, %v1257_v59 }
 0xafc   :  { %v1263_v61 = vadd.f32 %v1261_v60, %v2785_v33 }
 0xafe   :  { %v1267_v62 = vsel %vm360_vm8, %v1263_v61, -inf }
 0xaff   :  { %1268 = vmax.xlane.f32.xlu0 %v1267_v62 }
 0xb13   :  { %1309 = vrot.lane.b32.xlu0 %v1238_v47, %s2617_s12 }
 0xb1b   :  { %1420 = vrot.lane.b32.xlu0 %v1237_v54, %s2618_s13 }
 0xb23   :  { %1514 = vrot.lane.b32.xlu0 %v1237_v54, %s2619_s14 }
 0xb6a   :  { %v1266_v63 = vpop.xlane.xlu2 %1265 }
 0xb6b   :  { %v1270_v0 = vsub.f32 %v1262_v57, %v1266_v63 }
 0xb6d   :  { %v1272_v1 = vmul.f32 1.442695, %v1270_v0 }
 0xb6f   :  { %2543 = vpow2.f32 %v1272_v1 }
 0xb72   :  { %v1269_v28 = vpop.xlane.xlu0 %1268 }
 0xb73   :  { %v1271_v2 = vsub.f32 %v1263_v61, %v1269_v28 }
 0xb75   :  { %v2544_v20 = vpop.eup %2543  ;;  %v1274_v5 = vmul.f32 1.442695, %v1271_v2 }
 0xb76   :  { %v1276_v6 = vsel %vm360_vm8, %v2544_v20, 0.0 }
 0xb77   :  { %2545 = vpow2.f32 %v1274_v5  ;;  %1277 = vadd.xlane.f32.xlu1 %v1276_v6 }
 0xb7d   :  { %v2546_v33 = vpop.eup %2545 }
 0xb7e   :  { %v1279_v9 = vsel %vm360_vm8, %v2546_v33, 0.0 }
 0xb7f   :  { %1280 = vadd.xlane.f32.xlu2 %v1279_v9 }
 0xb85   :  { %v1310_v10 = vpop.permute.xlu0 %1309 }
 0xb86   :  { %v1315_v11 = vsel %vm335_vm7, %v1310_v10, 0 }
 0xb87   :  { %1324 = vmatpush.bf16.xpose.msra.mxu0 %v1315_v11 }
 0xb8d   :  { %v1421_v21 = vpop.permute.xlu0 %1420 }
 0xb8f   :  { %1413 = vmatpush.bf16.msrb.mxu0 %v1404_v24 }
 0xb90   :  { %1306 = vrot.lane.b32.xlu1 %v1237_v54, %s2617_s12 }
 0xb95   :  { %v1515_v52 = vpop.permute.xlu0 %1514 }
 0xb97   :  { %1422 = vrot.lane.b32.xlu2 %v1238_v47, %s2618_s13 }
 0xb98   :  { %1516 = vrot.lane.b32.xlu1 %v1238_v47, %s2619_s14 }
 0xbea   :  { %v1278_v3 = vpop.xlane.xlu1 %1277 }
 0xbeb   :  { %2547 = vrcp.f32 %v1278_v3 }
 0xbf1   :  { %v2548_v14 = vpop.eup %2547 }
 0xbf2   :  { %v1281_v13 = vpop.xlane.xlu2 %1280  ;;  %v1284_v15 = vmul.f32 %v2548_v14, %v2544_v20 }
 0xbf3   :  { %2549 = vrcp.f32 %v1281_v13 }
 0xbf9   :  { %v2550_v4 = vpop.eup %2549 }
 0xbfa   :  { %v1285_v16 = vmul.f32 %v2550_v4, %v2546_v33  ;;  %v1423_v17 = vpop.permute.xlu2 %1422 }
 0xbfb   :  { %v1428_v18 = vsel %vm335_vm7, %v1423_v17, 0 }
 0xbfc   :  { %v1286_v19 = vpack.c.bf16 %v1285_v16, %v1284_v15  ;;  %1437 = vmatpush.bf16.xpose.msra.mxu1 %v1428_v18 }
 0xbfe   :  { %2303 = vmatmul.msk.bf16.vlgmr.msrb.gmra.mxu3 %vm360_vm8, %v1286_v19 }
 0xc02   :  { %v1307_v22 = vpop.permute.xlu1 %1306 }
 0xc03   :  { %2304 = vmatmul.msk.bf16.vlgmr.msra.gmra.mxu0 %vm335_vm7, %v1307_v22  ;;  %2308 = vmatmul.msk.bf16.vlgmr.msra.gmra.mxu1 %vm335_vm7, %v1421_v21 }
 0xc0a   :  { %v1517_v23 = vpop.permute.xlu1 %1516 }
 0xc0b   :  { %v1522_v26 = vsel %vm335_vm7, %v1517_v23, 0 }
 0xc0c   :  { %1531 = vmatpush.bf16.xpose.msra.mxu0 %v1522_v26 }
 0xc80   :  { %v1326_v27 = vpop.f32.mrf.mxu0  ;;  %v1439_v29 = vpop.f32.mrf.mxu1 }
 0xc81   :  { %v1331_v25 = vmul.f32 0.35355338, %v1326_v27  ;;  %v1444_v30 = vmul.f32 0.35355338, %v1439_v29  ;;  %v1299_v31 = vpop.f32.mrf.mxu3 }
 0xc83   :  { %v1333_v36 = vadd.f32 %v2587_v35, %v1331_v25  ;;  %v1446_v37 = vadd.f32 %v2587_v35, %v1444_v30 }
 0xc85   :  { %v1335_v39 = vsel %vm360_vm8, %v1333_v36, -inf  ;;  %v1448_v8 = vsel %vm360_vm8, %v1446_v37, -inf }
 0xc86   :  { %1336 = vmax.xlane.f32.xlu2 %v1335_v39  ;;  %1449 = vmax.xlane.f32.xlu0 %v1448_v8 }
 0xc88   :  { %v1328_v40 = vpop.f32.mrf.mxu0  ;;  %v1441_v41 = vpop.f32.mrf.mxu1 }
 0xc89   :  { %v1332_v42 = vmul.f32 0.35355338, %v1328_v40  ;;  %v1445_v43 = vmul.f32 0.35355338, %v1441_v41  ;;  %v1301_v44 = vpop.f32.mrf.mxu3 }
 0xc8a   :  { %v1304_v45 = vpack.c.bf16 %v1301_v44, %v1299_v31 }
 0xc8b   :  { %v1334_v47 = vadd.f32 %v2588_v46, %v1332_v42  ;;  %v1447_v49 = vadd.f32 %v2588_v46, %v1445_v43 }
 0xc8c   :  { %2307 = vmatmul.msk.bf16.vlgmr.msrb.gmra.mxu0 %vm335_vm7, %v1304_v45 }
 0xc8d   :  { %v1338_v50 = vsel %vm360_vm8, %v1334_v47, -inf  ;;  %v1451_v51 = vsel %vm360_vm8, %v1447_v49, -inf }
 0xc8e   :  { %1339 = vmax.xlane.f32.xlu1 %v1338_v50  ;;  %1452 = vmax.xlane.f32.xlu2 %v1451_v51 }
 0xc9c   :  { %2311 = vmatmul.msk.bf16.vlgmr.msra.gmra.mxu0 %vm335_vm7, %v1515_v52  ;;  %v2299_v52 = vld [vmem:[%s3173_s2 + $0x1c4] sm:$0xf] }
 0xcf9   :  { %v1337_v53 = vpop.xlane.xlu2 %1336  ;;  %v1450_v54 = vpop.xlane.xlu0 %1449 }
 0xcfa   :  { %v1341_v55 = vsub.f32 %v1333_v36, %v1337_v53  ;;  %v1454_v57 = vsub.f32 %v1446_v37, %v1450_v54  ;;  %v1384_v53 = vsel %vm480_vm9, %v2299_v52, 0 }
 0xcfb   :  { %1393 = vmatpush.bf16.msra.mxu3 %v1384_v53 }
 0xcfc   :  { %v1343_v56 = vmul.f32 1.442695, %v1341_v55  ;;  %v1456_v58 = vmul.f32 1.442695, %v1454_v57 }
 0xcfe   :  { %2551 = vpow2.f32 %v1343_v56 }
 0xcff   :  { %2553 = vpow2.f32 %v1456_v58 }
 0xd01   :  { %v1340_v1 = vpop.xlane.xlu1 %1339  ;;  %v1453_v5 = vpop.xlane.xlu2 %1452 }
 0xd02   :  { %v1342_v28 = vsub.f32 %v1334_v47, %v1340_v1  ;;  %v1455_v9 = vsub.f32 %v1447_v49, %v1453_v5 }
 0xd04   :  { %v2552_v59 = vpop.eup %2551  ;;  %v1345_v2 = vmul.f32 1.442695, %v1342_v28  ;;  %v1458_v11 = vmul.f32 1.442695, %v1455_v9  ;;  %v2301_v28 = vld [vmem:[%s3173_s2 + $0x1cc] sm:$0xf] }
 0xd05   :  { %v1347_v60 = vsel %vm360_vm8, %v2552_v59, 0.0  ;;  %v3061_v62 = vpop.eup %2553 }
 0xd06   :  { %1348 = vadd.xlane.f32.xlu2 %v1347_v60  ;;  %v1460_v63 = vsel %vm360_vm8, %v3061_v62, 0.0  ;;  %2555 = vpow2.f32 %v1345_v2  ;;  %v1590_v2 = vsel %vm480_vm9, %v2301_v28, 0  ;;  %v1655_v28 = vperm.slane %v3014_v38, 4 }
 0xd07   :  { %2557 = vpow2.f32 %v1458_v11 }
 0xd09   :  { %v3059_v61 = vpop.f32.mrf.mxu0 }
 0xd0c   :  { %v2556_v3 = vpop.eup %2555 }
 0xd0d   :  { %v1350_v14 = vsel %vm360_vm8, %v2556_v3, 0.0  ;;  %v2558_v15 = vpop.eup %2557 }
 0xd0e   :  { %1461 = vadd.xlane.f32.xlu2 %v1460_v63  ;;  %v1463_v16 = vsel %vm360_vm8, %v2558_v15, 0.0  ;;  %v2300_v63 = vld [vmem:[%s3173_s2 + $0x1c8] sm:$0xf] }
 0xd0f   :  { %v1496_v1 = vsel %vm480_vm9, %v2300_v63, 0 }
 0xd10   :  { %1505 = vmatpush.bf16.msrb.mxu3 %v1496_v1 }
 0xd11   :  { %v3065_v0 = vpop.f32.mrf.mxu0 }
 0xd19   :  { %v1533_v20 = vpop.f32.mrf.mxu0 }
 0xd1a   :  { %v1538_v6 = vmul.f32 0.35355338, %v1533_v20 }
 0xd1c   :  { %v1540_v33 = vadd.f32 %v2587_v35, %v1538_v6 }
 0xd1e   :  { %v1542_v10 = vsel %vm360_vm8, %v1540_v33, -inf }
 0xd1f   :  { %1543 = vmax.xlane.f32.xlu1 %v1542_v10 }
 0xd21   :  { %v1535_v12 = vpop.f32.mrf.mxu0 }
 0xd22   :  { %v1539_v24 = vmul.f32 0.35355338, %v1535_v12 }
 0xd24   :  { %v1541_v13 = vadd.f32 %v2588_v46, %v1539_v24 }
 0xd26   :  { %v1545_v4 = vsel %vm360_vm8, %v1541_v13, -inf }
 0xd27   :  { %1351 = vadd.xlane.f32.xlu1 %v1350_v14  ;;  %1546 = vmax.xlane.f32.xlu0 %v1545_v4  ;;  %v1608_v14 = vperm.slane %v3014_v38, 3 }
 0xd2f   :  { %1464 = vadd.xlane.f32.xlu1 %v1463_v16 }
 0xd3b   :  { %1359 = vrot.lane.b32.xlu0 %v3018_v48, %s2617_s12 }
 0xd43   :  { %1565 = vrot.lane.b32.xlu0 %v3018_v48, %s2619_s14 }
 0xd79   :  { %v1349_v25 = vpop.xlane.xlu2 %1348 }
 0xd81   :  { %v1462_v42 = vpop.xlane.xlu2 %1461 }
 0xd92   :  { %v1544_v17 = vpop.xlane.xlu1 %1543 }
 0xd93   :  { %v1548_v18 = vsub.f32 %v1540_v33, %v1544_v17 }
 0xd95   :  { %v1550_v19 = vmul.f32 1.442695, %v1548_v18 }
 0xd97   :  { %2559 = vpow2.f32 %v1550_v19 }
 0xd9a   :  { %v1547_v21 = vpop.xlane.xlu0 %1546  ;;  %v1352_v29 = vpop.xlane.xlu1 %1351 }
 0xd9b   :  { %v1549_v22 = vsub.f32 %v1541_v13, %v1547_v21 }
 0xd9d   :  { %v2560_v23 = vpop.eup %2559  ;;  %v1552_v26 = vmul.f32 1.442695, %v1549_v22 }
 0xd9e   :  { %v1554_v27 = vsel %vm360_vm8, %v2560_v23, 0.0 }
 0xd9f   :  { %2561 = vpow2.f32 %v1552_v26  ;;  %1555 = vadd.xlane.f32.xlu2 %v1554_v27 }
 0xda0   :  { %2563 = vrcp.f32 %v1352_v29 }
 0xda1   :  { %2565 = vrcp.f32 %v1349_v25 }
 0xda2   :  { %v1465_v43 = vpop.xlane.xlu1 %1464 }
 0xda3   :  { %2567 = vrcp.f32 %v1465_v43  ;;  %v2475_v43 = vld [vmem:[%s3174_s3 + $0x88] sm:$0xff] }
 0xda4   :  { %2569 = vrcp.f32 %v1462_v42  ;;  %v2476_v42 = vld [vmem:[%s3174_s3 + $0x90] sm:$0xff] }
 0xda5   :  { %v2562_v30 = vpop.eup %2561 }
 0xda6   :  { %v1557_v31 = vsel %vm360_vm8, %v2562_v30, 0.0  ;;  %v2564_v35 = vpop.eup %2563 }
 0xda7   :  { %1558 = vadd.xlane.f32.xlu1 %v1557_v31  ;;  %v2566_v36 = vpop.eup %2565  ;;  %v1356_v37 = vmul.f32 %v2564_v35, %v2556_v3 }
 0xda8   :  { %v1355_v39 = vmul.f32 %v2566_v36, %v2552_v59 }
 0xda9   :  { %v2568_v45 = vpop.eup %2567 }
 0xdaa   :  { %v1357_v40 = vpack.c.bf16 %v1356_v37, %v1355_v39  ;;  %v2570_v46 = vpop.eup %2569  ;;  %v1469_v47 = vmul.f32 %v2568_v45, %v2558_v15  ;;  %v2481_v39 = vld [vmem:[%s3174_s3 + $0xb8] sm:$0xff] }
 0xdab   :  { %v1468_v49 = vmul.f32 %v2570_v46, %v3061_v62  ;;  %v2474_v46 = vld [vmem:[%s3174_s3 + $0x80] sm:$0xff] }
 0xdad   :  { %v1360_v8 = vpop.permute.xlu0 %1359 }
 0xdae   :  { %1372 = vmatpush.bf16.msra.mxu2 %v1360_v8  ;;  %v2479_v8 = vld [vmem:[%s3174_s3 + $0xa8] sm:$0xff] }
 0xdb1   :  { %2305 = vmatmul.msk.bf16.vlgmr.msra.gmra.mxu2 %vm360_vm8, %v1357_v40  ;;  %v2478_v40 = vld [vmem:[%s3174_s3 + $0xa0] sm:$0xff] }
 0xdb5   :  { %v1566_v41 = vpop.permute.xlu0 %1565 }
 0xdb6   :  { %1578 = vmatpush.bf16.msrb.mxu1 %v1566_v41  ;;  %v2477_v41 = vld [vmem:[%s3174_s3 + $0x98] sm:$0xff] }
 0xdb7   :  { %1471 = vrot.lane.b32.xlu2 %v3018_v48, %s2618_s13  ;;  %v1470_v48 = vpack.c.bf16 %v1469_v47, %v1468_v49 }
 0xe12   :  { %v1556_v44 = vpop.xlane.xlu2 %1555 }
 0xe13   :  { %2571 = vrcp.f32 %v1556_v44 }
 0xe19   :  { %v2572_v54 = vpop.eup %2571 }
 0xe1a   :  { %v1472_v50 = vpop.permute.xlu2 %1471  ;;  %v1559_v51 = vpop.xlane.xlu1 %1558  ;;  %v1562_v56 = vmul.f32 %v2572_v54, %v2560_v23 }
 0xe1b   :  { %2573 = vrcp.f32 %v1559_v51  ;;  %1484 = vmatpush.bf16.msrb.mxu2 %v1472_v50 }
 0xe1e   :  { %2309 = vmatmul.msk.bf16.vlgmr.msrb.gmra.mxu2 %vm360_vm8, %v1470_v48 }
 0xe1f   :  { %1599 = vmatpush.bf16.msra.mxu2 %v1590_v2 }
 0xe21   :  { %v2574_v55 = vpop.eup %2573 }
 0xe22   :  { %v1563_v57 = vmul.f32 %v2574_v55, %v2562_v30 }
 0xe24   :  { %v1564_v58 = vpack.c.bf16 %v1563_v57, %v1562_v56 }
 0xe26   :  { %2312 = vmatmul.msk.bf16.vlgmr.msrb.gmra.mxu1 %vm360_vm8, %v1564_v58 }
 0xe34   :  { %v1374_v59 = vpop.f32.mrf.mxu2 }
 0xe3c   :  { %v1376_v60 = vpop.f32.mrf.mxu2 }
 0xe3d   :  { %v1379_v62 = vpack.c.bf16 %v1376_v60, %v1374_v59 }
 0xe3f   :  { %2306 = vmatmul.msk.bf16.vlgmr.msra.gmra.mxu3 %vm335_vm7, %v1379_v62 }
 0xe40   :  { %1728 = vmatpush.bf16.msra.mxu3 %v2481_v39 }
 0xea1   :  { %v1486_v20 = vpop.f32.mrf.mxu2 }
 0xea3   :  { %v1580_v5 = vpop.f32.mrf.mxu1 }
 0xea9   :  { %v1488_v6 = vpop.f32.mrf.mxu2 }
 0xeaa   :  { %v1491_v33 = vpack.c.bf16 %v1488_v6, %v1486_v20 }
 0xeab   :  { %v1582_v9 = vpop.f32.mrf.mxu1 }
 0xeac   :  { %v1585_v10 = vpack.c.bf16 %v1582_v9, %v1580_v5  ;;  %2310 = vmatmul.msk.bf16.vlgmr.msrb.gmra.mxu3 %vm335_vm7, %v1491_v33  ;;  %v1658_v33 = vperm.slane %v3014_v38, 5 }
 0xeae   :  { %2313 = vmatmul.msk.bf16.vlgmr.msra.gmra.mxu2 %vm335_vm7, %v1585_v10 }
 0xec2   :  { %v1395_v11 = vpop.f32.mrf.mxu3 }
 0xec3   :  { %v1416_v24 = vadd.f32 %v3059_v61, %v1395_v11 }
 0xeca   :  { %v1397_v12 = vpop.f32.mrf.mxu3 }
 0xecb   :  { %v1418_v17 = vadd.f32 %v3065_v0, %v1397_v12 }
 0xf2f   :  { %v1507_v3 = vpop.f32.mrf.mxu3 }
 0xf30   :  { %v1512_v13 = vadd.f32 %v1507_v3, %v1416_v24  ;;  %v2489_v24 = vld [vmem:[%s3174_s3 + $0xf8] sm:$0xff]  ;;  %v2488_v3 = vld [vmem:[%s3174_s3 + $0xf0] sm:$0xff] }
 0xf31   :  { %v1601_v4 = vpop.f32.mrf.mxu2  ;;  %1827 = vmatpush.bf16.msrb.mxu0 %v2489_v24 }
 0xf32   :  { %v1606_v15 = vadd.f32 %v1601_v4, %v1512_v13  ;;  %v2487_v13 = vld [vmem:[%s3174_s3 + $0xe8] sm:$0xff]  ;;  %v2485_v4 = vld [vmem:[%s3174_s3 + $0xd8] sm:$0xff] }
 0xf34   :  { %v1609_v16 = vadd.f32 %v1608_v14, %v1606_v15  ;;  %v2484_v15 = vld [vmem:[%s3174_s3 + $0xd0] sm:$0xff] }
 0xf35   :  { %1828 = vmatpush.bf16.msrb.mxu0 %v2488_v3 }
 0xf36   :  { %v1611_v18 = vadd.f32 %v1609_v16, %v3005_v32  ;;  %v2483_v16 = vld [vmem:[%s3174_s3 + $0xc8] sm:$0xff] }
 0xf37   :  { %v1509_v19 = vpop.f32.mrf.mxu3 }
 0xf38   :  { %v1513_v21 = vadd.f32 %v1509_v19, %v1418_v17  ;;  %1613 = vadd.xlane.f32.xlu1 %v1611_v18  ;;  %v2482_v17 = vld [vmem:[%s3174_s3 + $0xc0] sm:$0xff] }
 0xf39   :  { %v1603_v22 = vpop.f32.mrf.mxu2  ;;  %1829 = vmatpush.bf16.msrb.mxu0 %v2487_v13 }
 0xf3a   :  { %v1607_v23 = vadd.f32 %v1603_v22, %v1513_v21 }
 0xf3c   :  { %v1610_v26 = vadd.f32 %v1608_v14, %v1607_v23  ;;  %v2486_v14 = vld [vmem:[%s3174_s3 + $0xe0] sm:$0xff] }
 0xf3d   :  { %1830 = vmatpush.bf16.msrb.mxu0 %v2486_v14 }
 0xf3e   :  { %v1612_v27 = vadd.f32 %v1610_v26, %v3007_v34  ;;  %v2480_v34 = vld [vmem:[%s3174_s3 + $0xb0] sm:$0xff] }
 0xf3f   :  { %1729 = vmatpush.bf16.msra.mxu3 %v2480_v34 }
 0xf40   :  { %1615 = vadd.xlane.f32.xlu0 %v1612_v27 }
 0xf41   :  { %1831 = vmatpush.bf16.msrb.mxu0 %v2485_v4 }
 0xf43   :  { %1730 = vmatpush.bf16.msra.mxu3 %v2479_v8 }
 0xf45   :  { %1832 = vmatpush.bf16.msrb.mxu0 %v2484_v15 }
 0xf47   :  { %1731 = vmatpush.bf16.msra.mxu3 %v2478_v40 }
 0xf49   :  { %1833 = vmatpush.bf16.msrb.mxu0 %v2483_v16 }
 0xf4b   :  { %1732 = vmatpush.bf16.msra.mxu3 %v2477_v41 }
 0xf4d   :  { %1834 = vmatpush.bf16.msrb.mxu0 %v2482_v17 }
 0xf4f   :  { %1733 = vmatpush.bf16.msra.mxu3 %v2476_v42 }
 0xf53   :  { %1734 = vmatpush.bf16.msra.mxu3 %v2475_v43 }
 0xf57   :  { %1735 = vmatpush.bf16.msra.mxu3 %v2474_v46 }
 0xfab   :  { %v1614_v61 = vpop.xlane.xlu1 %1613 }
 0xfac   :  { %v1617_v29 = vmul.f32 0.03125, %v1614_v61 }
 0xfae   :  { %v1619_v25 = vsub.f32 %v1611_v18, %v1617_v29  ;;  %v1679_v18 = vperm.slane %v3014_v38, 6 }
 0xfb0   :  { %v1621_v30 = vmul.f32 %v2667_v7, %v1619_v25 }
 0xfb2   :  { %v1623_v31 = vmul.f32 %v1621_v30, %v1621_v30 }
 0xfb3   :  { %v1616_v35 = vpop.xlane.xlu0 %1615 }
 0xfb4   :  { %v1618_v36 = vmul.f32 0.03125, %v1616_v35  ;;  %1625 = vadd.xlane.f32.xlu1 %v1623_v31 }
 0xfb6   :  { %v1620_v0 = vsub.f32 %v1612_v27, %v1618_v36 }
 0xfb8   :  { %v1622_v32 = vmul.f32 %v2667_v7, %v1620_v0 }
 0xfba   :  { %v1624_v37 = vmul.f32 %v1622_v32, %v1622_v32 }
 0xfbc   :  { %1627 = vadd.xlane.f32.xlu1 %v1624_v37 }
0x1027   :  { %v1626_v44 = vpop.xlane.xlu1 %1625 }
0x1028   :  { %v1629_v45 = vmul.f32 0.03125, %v1626_v44  ;;  %v1778_v44 = vperm.slane %v3014_v38, 7 }
0x102a   :  { %v1631_v47 = vadd.f32 1e-12, %v1629_v45 }
0x102c   :  { %2575 = vrsqrt.f32 %v1631_v47  ;;  %vm1639_vm7 = vweird.f32 %v1631_v47 }
0x102f   :  { %v1628_v49 = vpop.xlane.xlu1 %1627 }
0x1030   :  { %v1630_v50 = vmul.f32 0.03125, %v1628_v49 }
0x1032   :  { %v2576_v51 = vpop.eup %2575  ;;  %v1632_v52 = vadd.f32 1e-12, %v1630_v50 }
0x1033   :  { %v1634_v48 = vmul.f32 %v2576_v51, %v1631_v47  ;;  %vm1640_vm6 = vweird.f32 %v2576_v51 }
0x1034   :  { %2577 = vrsqrt.f32 %v1632_v52  ;;  %vm1641_vm8 = vmor %vm1639_vm7, %vm1640_vm6  ;;  %vm1649_vm10 = vweird.f32 %v1632_v52 }
0x1035   :  { %v1635_v53 = vmul.f32 %v2576_v51, %v1634_v48 }
0x1037   :  { %v1636_v54 = vmul.f32 0.5, %v1635_v53 }
0x1039   :  { %v1637_v55 = vsub.f32 1.5, %v1636_v54 }
0x103a   :  { %v2578_v56 = vpop.eup %2577 }
0x103b   :  { %v1638_v57 = vmul.f32 %v2576_v51, %v1637_v55  ;;  %v1644_v58 = vmul.f32 %v2578_v56, %v1632_v52  ;;  %vm1650_vm9 = vweird.f32 %v2578_v56 }
0x103c   :  { %vm1651_vm11 = vmor %vm1649_vm10, %vm1650_vm9 }
0x103d   :  { %v1645_v59 = vmul.f32 %v2578_v56, %v1644_v58  ;;  %v1642_v60 = vsel %vm1641_vm8, %v2576_v51, %v1638_v57 }
0x103e   :  { %v1653_v1 = vmul.f32 %v1642_v60, %v1621_v30 }
0x103f   :  { %v1646_v62 = vmul.f32 0.5, %v1645_v59 }
0x1040   :  { %v1656_v6 = vmul.f32 %v1655_v28, %v1653_v1 }
0x1041   :  { %v1647_v63 = vsub.f32 1.5, %v1646_v62 }
0x1042   :  { %v1659_v10 = vadd.f32 %v1658_v33, %v1656_v6 }
0x1043   :  { %v1648_v2 = vmul.f32 %v2578_v56, %v1647_v63 }
0x1045   :  { %v1652_v20 = vsel %vm1651_vm11, %v2578_v56, %v1648_v2 }
0x1046   :  { %v1654_v5 = vmul.f32 %v1652_v20, %v1622_v32 }
0x1048   :  { %v1657_v9 = vmul.f32 %v1655_v28, %v1654_v5 }
0x104a   :  { %v1660_v11 = vadd.f32 %v1658_v33, %v1657_v9 }
0x104c   :  { %v1661_v12 = vpack.c.bf16 %v1660_v11, %v1659_v10 }
0x104e   :  { %1736 = vmatmul.bf16.vlgmr.msra.gmra.mxu3 %v1661_v12  ;;  %v2153_v12 = vld [vmem:[%s3175_s4 + $0x18] sm:$0x3] }
0x104f   :  { %v1885_v14 = vperm.slane %v2153_v12, 0  ;;  %v1888_v17 = vperm.slane %v2153_v12, 1 }
0x10d1   :  { %v1737_v19 = vpop.f32.mrf.mxu3 }
0x10d2   :  { %v1738_v21 = vadd.f32 %v1737_v19, %v1679_v18 }
0x10d4   :  { %v1744_v22 = vmul.f32 0.044715, %v1738_v21  ;;  %v1742_v34 = vmul.f32 0.5, %v1738_v21 }
0x10d6   :  { %v1746_v23 = vmul.f32 %v1744_v22, %v1738_v21 }
0x10d8   :  { %v1748_v26 = vmul.f32 %v1746_v23, %v1738_v21 }
0x10d9   :  { %v1739_v27 = vpop.f32.mrf.mxu3 }
0x10da   :  { %v1750_v61 = vadd.f32 %v1748_v26, %v1738_v21  ;;  %v1740_v29 = vadd.f32 %v1739_v27, %v1679_v18  ;;  %v2589_v26 = vld [vmem:[%s3176_s5] sm:$0xf] }
0x10db   :  { %v1897_v27 = vperm.slane %v2589_v26, 2 }
0x10dc   :  { %v1745_v25 = vmul.f32 0.044715, %v1740_v29  ;;  %v1752_v30 = vmul.f32 0.7978846, %v1750_v61  ;;  %v1743_v8 = vmul.f32 0.5, %v1740_v29 }
0x10de   :  { %v1747_v31 = vmul.f32 %v1745_v25, %v1740_v29  ;;  %2579 = vtanh.f32 %v1752_v30 }
0x10e0   :  { %v1749_v35 = vmul.f32 %v1747_v31, %v1740_v29 }
0x10e2   :  { %v1751_v36 = vadd.f32 %v1749_v35, %v1740_v29  ;;  %v1903_v35 = vperm.slane %v2589_v26, 3 }
0x10e4   :  { %v1753_v0 = vmul.f32 0.7978846, %v1751_v36  ;;  %v2580_v32 = vpop.eup %2579 }
0x10e5   :  { %v1756_v37 = vadd.f32 1.0, %v2580_v32 }
0x10e6   :  { %2581 = vtanh.f32 %v1753_v0 }
0x10e7   :  { %v1758_v41 = vmul.f32 %v1756_v37, %v1742_v34 }
0x10ec   :  { %v2582_v39 = vpop.eup %2581 }
0x10ed   :  { %v1757_v40 = vadd.f32 1.0, %v2582_v39 }
0x10ef   :  { %v1759_v42 = vmul.f32 %v1757_v40, %v1743_v8 }
0x10f1   :  { %v1760_v43 = vpack.c.bf16 %v1759_v42, %v1758_v41 }
0x10f3   :  { %1835 = vmatmul.bf16.vlgmr.msrb.gmra.mxu0 %v1760_v43 }
0x1170   :  { %v1836_v45 = vpop.f32.mrf.mxu0 }
0x1171   :  { %v1837_v46 = vadd.f32 %v1836_v45, %v1778_v44 }
0x1173   :  { %v1841_v47 = vadd.f32 %v1837_v46, %v1659_v10 }
0x1175   :  { %1843 = vadd.xlane.f32.xlu1 %v1841_v47 }
0x1178   :  { %v1838_v49 = vpop.f32.mrf.mxu0 }
0x1179   :  { %v1839_v50 = vadd.f32 %v1838_v49, %v1778_v44 }
0x117b   :  { %v1842_v51 = vadd.f32 %v1839_v50, %v1660_v11 }
0x117d   :  { %1845 = vadd.xlane.f32.xlu2 %v1842_v51 }
0x11e8   :  { %v1844_v52 = vpop.xlane.xlu1 %1843 }
0x11e9   :  { %v1847_v54 = vmul.f32 0.03125, %v1844_v52 }
0x11eb   :  { %v1849_v57 = vsub.f32 %v1841_v47, %v1847_v54 }
0x11ed   :  { %v1851_v38 = vmul.f32 %v2667_v7, %v1849_v57 }
0x11ef   :  { %v1853_v59 = vmul.f32 %v1851_v38, %v1851_v38 }
0x11f0   :  { %v1846_v48 = vpop.xlane.xlu2 %1845 }
0x11f1   :  { %v1848_v53 = vmul.f32 0.03125, %v1846_v48 }
0x11f3   :  { %v1850_v55 = vsub.f32 %v1842_v51, %v1848_v53 }
0x11f5   :  { %v1852_v56 = vmul.f32 %v2667_v7, %v1850_v55 }
0x11f7   :  { %v1854_v58 = vmul.f32 %v1852_v56, %v1852_v56 }
0x11f9   :  { %1857 = vadd.xlane.f32.xlu1 %v1854_v58 }
0x1201   :  { %1855 = vadd.xlane.f32.xlu1 %v1853_v59 }
0x126c   :  { %v1858_v60 = vpop.xlane.xlu1 %1857 }
0x126d   :  { %v1860_v62 = vmul.f32 0.03125, %v1858_v60 }
0x126f   :  { %v1862_v63 = vadd.f32 1e-12, %v1860_v62 }
0x1271   :  { %2583 = vrsqrt.f32 %v1862_v63  ;;  %vm1879_vm13 = vweird.f32 %v1862_v63 }
0x1274   :  { %v1856_v1 = vpop.xlane.xlu1 %1855 }
0x1275   :  { %v1859_v28 = vmul.f32 0.03125, %v1856_v1 }
0x1277   :  { %v2584_v2 = vpop.eup %2583  ;;  %v1861_v20 = vadd.f32 1e-12, %v1859_v28 }
0x1278   :  { %v1874_v5 = vmul.f32 %v2584_v2, %v1862_v63  ;;  %vm1880_vm12 = vweird.f32 %v2584_v2 }
0x1279   :  { %2585 = vrsqrt.f32 %v1861_v20  ;;  %vm1881_vm14 = vmor %vm1879_vm13, %vm1880_vm12  ;;  %vm1869_vm0 = vweird.f32 %v1861_v20 }
0x127a   :  { %v1875_v6 = vmul.f32 %v2584_v2, %v1874_v5 }
0x127c   :  { %v1876_v33 = vmul.f32 0.5, %v1875_v6 }
0x127e   :  { %v1877_v9 = vsub.f32 1.5, %v1876_v33 }
0x127f   :  { %v2586_v10 = vpop.eup %2585 }
0x1280   :  { %v1878_v11 = vmul.f32 %v2584_v2, %v1877_v9  ;;  %v1864_v7 = vmul.f32 %v2586_v10, %v1861_v20  ;;  %vm1870_vm15 = vweird.f32 %v2586_v10 }
0x1281   :  { %vm1871_vm1 = vmor %vm1869_vm0, %vm1870_vm15 }
0x1282   :  { %v1882_v24 = vsel %vm1881_vm14, %v2584_v2, %v1878_v11  ;;  %v1865_v3 = vmul.f32 %v2586_v10, %v1864_v7 }
0x1283   :  { %v1884_v13 = vmul.f32 %v1882_v24, %v1852_v56 }
0x1284   :  { %v1866_v4 = vmul.f32 0.5, %v1865_v3 }
0x1285   :  { %v1887_v16 = vmul.f32 %v1885_v14, %v1884_v13 }
0x1286   :  { %v1867_v15 = vsub.f32 1.5, %v1866_v4 }
0x1287   :  { %v1890_v22 = vadd.f32 %v1888_v17, %v1887_v16 }
0x1288   :  { %v1868_v18 = vmul.f32 %v2586_v10, %v1867_v15 }
0x1289   :  { %v1892_v29 = vrot.slane %v1890_v22, 7 }
0x128a   :  { %v1872_v19 = vsel %vm1871_vm1, %v2586_v10, %v1868_v18 }
0x128b   :  { %v1883_v21 = vmul.f32 %v1872_v19, %v1851_v38 }
0x128d   :  { %v1886_v23 = vmul.f32 %v1885_v14, %v1883_v21 }
0x128f   :  { %v1889_v61 = vadd.f32 %v1888_v17, %v1886_v23 }
0x1291   :  { %v1895_v25 = vsel %vm1894_vm2, %v1889_v61, %v1892_v29 }
0x1292   :  { %v1898_v30 = vmul.f32 %v1897_v27, %v1895_v25  ;;  %1896 = vst [vmem:[#allocation2] sm:$0x3] %v1895_v25 }
0x1293   :  { %1919 = dma.vmem_to_hbm [thread:$0]  %s1915_s17, 32, %s1917_s19, [#allocation3]  }
0x1294   :  { %v1900_v31 = vsel %vm1899_vm3, %v1898_v30, 0.0 }
0x1295   :  { %1901 = vadd.xlane.f32.xlu0 %v1900_v31 }
0x1308   :  { %v1902_v36 = vpop.xlane.xlu0 %1901 }
0x1309   :  { %v1904_v0 = vadd.f32 %v1903_v35, %v1902_v36 }
0x130b   :  { %1906 = vst.msk [vmem:[%s3177_s6] sm:$0x3] %vm1905_vm4, %v1904_v0 }
0x130c   :  { %2614 = dma.done.wait [#allocation3], 32  }
0x130d   :  { %2615 = vsyncadd [#allocation3], 4294967264 }
0x130e   :  { %1926 = vsyncpa [#allocation3], 1 }

</bundles_post_ra>
